<compile_context>
chip_gen: v7x
topology: tpu7x:2x2x1
jax: 0.10.0
libtpu: 0.0.40
codegen_flags: <defaults>
</compile_context>

<pallas_src>
import math

import jax
import jax.numpy as jnp
from jax import lax
from jax.experimental import pallas as pl
from jax.experimental.pallas import tpu as pltpu


# ------------------------------ Pallas kernel ------------------------------ #

def _make_encoder_layer_kernel(n_heads, eps=1e-5, exact_softmax=False):
    def kernel(x_ref,
               wqkv_ref, bqkv_ref, wo_ref, bo_ref,
               w1_ref, b1_ref, w2_ref, b2_ref,
               g1_ref, be1_ref, g2_ref, be2_ref,
               o_ref,
               q_scr, k_scr, v_scr, attn_scr):
        Bt, L, D = x_ref.shape
        hd = D // n_heads
        mxu_dtype = wqkv_ref.dtype          # f32 by default; bf16 on v6e/v7x

        # (Bt, L, D) -> (Bt*L, D): merging leading (major) dims is layout-trivial.
        x2d = x_ref[...].astype(jnp.float32).reshape(Bt * L, D)

        # -------- fused QKV projection: one dense (N, D) x (D, 3D) dot -------- #
        qkv = jnp.dot(x2d.astype(mxu_dtype), wqkv_ref[...],
                      preferred_element_type=jnp.float32) + bqkv_ref[...]

        # Split into per-(batch, head) blocks via scratch stores (pure data
        # movement; no per-head matmuls, no 4-D transposes).
        for b in range(Bt):
            rows = slice(b * L, (b + 1) * L)
            for h in range(n_heads):
                g = b * n_heads + h
                q_scr[g] = qkv[rows, h * hd:(h + 1) * hd]
                k_scr[g] = qkv[rows, D + h * hd:D + (h + 1) * hd]
                v_scr[g] = qkv[rows, 2 * D + h * hd:2 * D + (h + 1) * hd]

        qh = q_scr[...]                     # (G, L, hd), G = Bt * n_heads
        kh = k_scr[...]
        vh = v_scr[...]

        # 1/sqrt(hd) was folded into the Q columns of wqkv in the wrapper.
        s = jnp.einsum('glc,gmc->glm', qh.astype(mxu_dtype), kh.astype(mxu_dtype),
                       preferred_element_type=jnp.float32)
        s = s - jnp.max(s, axis=-1, keepdims=True)
        p = jnp.exp(s)
        denom = jnp.sum(p, axis=-1, keepdims=True)
        if exact_softmax:
            p = p / denom
        else:
            p = p * pl.reciprocal(denom, approx=True)
        o3 = jnp.einsum('glm,gmc->glc', p.astype(mxu_dtype), vh.astype(mxu_dtype),
                        preferred_element_type=jnp.float32)     # (G, L, hd)

        # Merge heads back to (N, D) so the output projection is one dense
        # (N, D) x (D, D) dot with K = D (no K=hd matmuls, no cross-head sum).
        for b in range(Bt):
            for h in range(n_heads):
                attn_scr[b * L:(b + 1) * L, h * hd:(h + 1) * hd] = \
                    o3[b * n_heads + h]

        attn = jnp.dot(attn_scr[...].astype(mxu_dtype), wo_ref[...],
                       preferred_element_type=jnp.float32) + bo_ref[...]

        def layer_norm(t, g, b):
            mu = jnp.mean(t, axis=-1, keepdims=True)
            var = jnp.mean((t - mu) ** 2, axis=-1, keepdims=True)
            return (t - mu) * lax.rsqrt(var + eps) * g + b

        # dropout == identity (eval-mode semantics)
        x1 = layer_norm(x2d + attn, g1_ref[...], be1_ref[...])

        # ------------------------------- FFN ------------------------------- #
        h1 = jnp.maximum(
            jnp.dot(x1.astype(mxu_dtype), w1_ref[...],
                    preferred_element_type=jnp.float32) + b1_ref[...],
            0.0)
        ffn = jnp.dot(h1.astype(mxu_dtype), w2_ref[...],
                      preferred_element_type=jnp.float32) + b2_ref[...]
        x2 = layer_norm(x1 + ffn, g2_ref[...], be2_ref[...])

        o_ref[...] = x2.reshape(Bt, L, D).astype(o_ref.dtype)

    return kernel


def encoder_layer_pallas(x, kernel_params, n_heads, *, batch_block=None,
                         exact_softmax=False):
    B, L, D = x.shape
    F = kernel_params[4].shape[1]            # w1 is (D, F)
    Bt = B if batch_block is None else min(batch_block, B)
    assert B % Bt == 0, "batch_block must divide batch size"
    hd = D // n_heads
    G = Bt * n_heads

    kernel = _make_encoder_layer_kernel(n_heads, exact_softmax=exact_softmax)

    def full_spec(arr):
        nd = arr.ndim
        return pl.BlockSpec(arr.shape, lambda i, _nd=nd: (0,) * _nd)

    in_specs = [pl.BlockSpec((Bt, L, D), lambda i: (i, 0, 0))] \
        + [full_spec(w) for w in kernel_params]        # weights fully resident

    # Rough cost estimate so XLA schedules the surrounding graph sensibly.
    N = B * L
    flops = (2 * N * D * 3 * D) + 4 * N * L * D + 2 * N * D * D + 4 * N * D * F
    transc = B * n_heads * L * L + 4 * N
    bytes_accessed = 2 * x.size * x.dtype.itemsize + sum(
        int(p.size) * p.dtype.itemsize for p in kernel_params)

    return pl.pallas_call(
        kernel,
        out_shape=jax.ShapeDtypeStruct((B, L, D), x.dtype),
        grid=(B // Bt,),
        in_specs=in_specs,
        out_specs=pl.BlockSpec((Bt, L, D), lambda i: (i, 0, 0)),
        scratch_shapes=[
            pltpu.VMEM((G, L, hd), jnp.float32),    # Q heads
            pltpu.VMEM((G, L, hd), jnp.float32),    # K heads
            pltpu.VMEM((G, L, hd), jnp.float32),    # V heads
            pltpu.VMEM((Bt * L, D), jnp.float32),   # merged attention output
        ],
        compiler_params=pltpu.CompilerParams(
            # Disjoint output blocks per step -> parallel is safe.  On v7x,
            # CORE_PARALLEL / pl.core_map would be needed for an explicit
            # two-TensorCore split; at these shapes a single step is optimal.
            dimension_semantics=("parallel",)),
        cost_estimate=pl.CostEstimate(
            flops=int(flops), transcendentals=int(transc),
            bytes_accessed=int(bytes_accessed)),
    )(x, *kernel_params)


# ------------------- PyTorch-style params + wrapper prep ------------------- #

def init_torch_style_params(key, d_model, n_heads, ff_dim):
    """Parameters in nn.MultiheadAttention / nn.Linear (out, in) layout."""
    ks = jax.random.split(key, 8)
    s = 0.1
    n = lambda k, shape: jax.random.normal(k, shape, jnp.float32) * s
    in_w = n(ks[0], (3 * d_model, d_model))   # in_proj_weight
    in_b = n(ks[1], (3 * d_model,))           # in_proj_bias
    out_w = n(ks[2], (d_model, d_model))      # out_proj.weight
    out_b = n(ks[3], (d_model,))              # out_proj.bias
    w1 = n(ks[4], (ff_dim, d_model))          # ffn Linear1.weight
    b1 = n(ks[5], (ff_dim,))
    w2 = n(ks[6], (d_model, ff_dim))          # ffn Linear2.weight
    b2 = n(ks[7], (d_model,))
    g1 = jnp.ones((d_model,), jnp.float32)
    be1 = jnp.zeros((d_model,), jnp.float32)
    g2 = jnp.ones((d_model,), jnp.float32)
    be2 = jnp.zeros((d_model,), jnp.float32)
    return (in_w, in_b, out_w, out_b, w1, b1, w2, b2, g1, be1, g2, be2)


def prepare_kernel_params(p, n_heads, compute_dtype=jnp.float32):
    """One-time offline transform of PyTorch-layout weights.

    * in_proj stays fused as a single (D, 3D) matrix (dense MXU dot in-kernel);
      the 1/sqrt(head_dim) attention scale is folded into its Q columns.
    * out_proj stays a dense (D, D) matrix; FFN weights transposed to (in, out).
    * Matmul operands are cast to `compute_dtype` (use jnp.bfloat16 on v6e/v7x
      for full MXU rate); biases / LayerNorm params stay float32.
    """
    in_w, in_b, out_w, out_b, w1, b1, w2, b2, g1, be1, g2, be2 = p
    D = out_w.shape[0]
    F = w1.shape[0]
    hd = D // n_heads
    scale = 1.0 / math.sqrt(hd)

    wq, wk, wv = in_w[:D], in_w[D:2 * D], in_w[2 * D:]
    bq, bk, bv = in_b[:D], in_b[D:2 * D], in_b[2 * D:]
    wqkv = jnp.concatenate([wq.T * scale, wk.T, wv.T], axis=1)        # (D, 3D)
    bqkv = jnp.concatenate([bq * scale, bk, bv]).reshape(1, 3 * D)    # (1, 3D)

    cast = lambda a: a.astype(compute_dtype)
    return (cast(wqkv), bqkv,
            cast(out_w.T), out_b.reshape(1, D),
            cast(w1.T), b1.reshape(1, F),
            cast(w2.T), b2.reshape(1, D),
            g1.reshape(1, D), be1.reshape(1, D),
            g2.reshape(1, D), be2.reshape(1, D))


# ---------------------------- pure-JAX reference ---------------------------- #

def encoder_layer_ref(x, p, n_heads, eps=1e-5):
    in_w, in_b, out_w, out_b, w1, b1, w2, b2, g1, be1, g2, be2 = p
    B, L, D = x.shape
    hd = D // n_heads

    qkv = x @ in_w.T + in_b
    q, k, v = jnp.split(qkv, 3, axis=-1)

    def heads(t):
        return t.reshape(B, L, n_heads, hd).transpose(0, 2, 1, 3)

    q, k, v = heads(q), heads(k), heads(v)
    s = jnp.einsum('bhqc,bhkc->bhqk', q, k) / math.sqrt(hd)
    a = jax.nn.softmax(s, axis=-1)
    o = jnp.einsum('bhqk,bhkc->bhqc', a, v).transpose(0, 2, 1, 3).reshape(B, L, D)
    attn = o @ out_w.T + out_b

    def ln(t, g, b):
        mu = jnp.mean(t, -1, keepdims=True)
        var = jnp.mean((t - mu) ** 2, -1, keepdims=True)
        return (t - mu) / jnp.sqrt(var + eps) * g + b

    x1 = ln(x + attn, g1, be1)
    ffn = jnp.maximum(x1 @ w1.T + b1, 0.0) @ w2.T + b2
    return ln(x1 + ffn, g2, be2)


# ----------------------------------- main ----------------------------------- #

if __name__ == "__main__":
    d_model, n_heads, ff_dim = 32, 4, 64
    B, L = 2, 8

    key = jax.random.PRNGKey(0)
    kx, kp = jax.random.split(key)
    x = jax.random.normal(kx, (B, L, d_model), jnp.float32)

    torch_params = init_torch_style_params(kp, d_model, n_heads, ff_dim)
    # compute_dtype=jnp.bfloat16 is recommended on v6e/v7x for full MXU rate;
    # f32 is used here so the correctness check against the f32 reference is tight.
    kernel_params = prepare_kernel_params(torch_params, n_heads,
                                          compute_dtype=jnp.float32)

    # TODO(synk): dropout layers are treated as identity (inference semantics);
    # training-mode stochastic dropout is not implemented in the kernel.
    out = encoder_layer_pallas(x, kernel_params, n_heads)
    out = jax.block_until_ready(out)

    ref = encoder_layer_ref(x, torch_params, n_heads)
    assert out.shape == (B, L, d_model)
    assert jnp.allclose(out, ref, atol=1e-2, rtol=1e-2), \
        "Pallas output mismatch vs JAX reference"

    print("KERNEL_OK")
</pallas_src>

<mosaic_0001>
module attributes {stable_mosaic.version = 11 : i64} {
  func.func @kernel(%arg0: i32, %arg1: memref<2x8x32xf32, #tpu.memory_space<vmem>>, %arg2: memref<32x96xf32, #tpu.memory_space<vmem>>, %arg3: memref<1x96xf32, #tpu.memory_space<vmem>>, %arg4: memref<32x32xf32, #tpu.memory_space<vmem>>, %arg5: memref<1x32xf32, #tpu.memory_space<vmem>>, %arg6: memref<32x64xf32, #tpu.memory_space<vmem>>, %arg7: memref<1x64xf32, #tpu.memory_space<vmem>>, %arg8: memref<64x32xf32, #tpu.memory_space<vmem>>, %arg9: memref<1x32xf32, #tpu.memory_space<vmem>>, %arg10: memref<1x32xf32, #tpu.memory_space<vmem>>, %arg11: memref<1x32xf32, #tpu.memory_space<vmem>>, %arg12: memref<1x32xf32, #tpu.memory_space<vmem>>, %arg13: memref<1x32xf32, #tpu.memory_space<vmem>>, %arg14: memref<2x8x32xf32, #tpu.memory_space<vmem>>, %arg15: memref<8x8x8xf32, #tpu.memory_space<vmem>>, %arg16: memref<8x8x8xf32, #tpu.memory_space<vmem>>, %arg17: memref<8x8x8xf32, #tpu.memory_space<vmem>>, %arg18: memref<16x32xf32, #tpu.memory_space<vmem>>) attributes {dimension_semantics = [#tpu.dimension_semantics<parallel>], iteration_bounds = array<i64: 1>, scalar_prefetch = 0 : i64, scratch_operands = 4 : i64, tpu.core_type = #tpu.core_type<tc>, window_params = [{transform_indices = @transform_0, window_bounds = array<i64: 2, 8, 32>}, {pipeline_mode = #tpu.pipeline_mode<synchronous>, transform_indices = @transform_1, window_bounds = array<i64: 32, 96>}, {pipeline_mode = #tpu.pipeline_mode<synchronous>, transform_indices = @transform_2, window_bounds = array<i64: 1, 96>}, {pipeline_mode = #tpu.pipeline_mode<synchronous>, transform_indices = @transform_3, window_bounds = array<i64: 32, 32>}, {pipeline_mode = #tpu.pipeline_mode<synchronous>, transform_indices = @transform_4, window_bounds = array<i64: 1, 32>}, {pipeline_mode = #tpu.pipeline_mode<synchronous>, transform_indices = @transform_5, window_bounds = array<i64: 32, 64>}, {pipeline_mode = #tpu.pipeline_mode<synchronous>, transform_indices = @transform_6, window_bounds = array<i64: 1, 64>}, {pipeline_mode = #tpu.pipeline_mode<synchronous>, transform_indices = @transform_7, window_bounds = array<i64: 64, 32>}, {pipeline_mode = #tpu.pipeline_mode<synchronous>, transform_indices = @transform_8, window_bounds = array<i64: 1, 32>}, {pipeline_mode = #tpu.pipeline_mode<synchronous>, transform_indices = @transform_9, window_bounds = array<i64: 1, 32>}, {pipeline_mode = #tpu.pipeline_mode<synchronous>, transform_indices = @transform_10, window_bounds = array<i64: 1, 32>}, {pipeline_mode = #tpu.pipeline_mode<synchronous>, transform_indices = @transform_11, window_bounds = array<i64: 1, 32>}, {pipeline_mode = #tpu.pipeline_mode<synchronous>, transform_indices = @transform_12, window_bounds = array<i64: 1, 32>}, {transform_indices = @transform_13, window_bounds = array<i64: 2, 8, 32>}]} {
    %c0 = arith.constant 0 : index
    %c0_0 = arith.constant 0 : index
    %c0_1 = arith.constant 0 : index
    %0 = vector.load %arg1[%c0, %c0_0, %c0_1] : memref<2x8x32xf32, #tpu.memory_space<vmem>>, vector<2x8x32xf32>
    %1 = vector.shape_cast %0 : vector<2x8x32xf32> to vector<16x32xf32>
    %c0_2 = arith.constant 0 : index
    %c0_3 = arith.constant 0 : index
    %2 = vector.load %arg2[%c0_2, %c0_3] : memref<32x96xf32, #tpu.memory_space<vmem>>, vector<32x96xf32>
    %cst = arith.constant dense<0.000000e+00> : vector<16x96xf32>
    %3 = tpu.matmul %1, %2, %cst {dimension_numbers = #tpu.dot_dimension_numbers<[1], [0], [0], [1], [0, 0, 1, 1], [], []>} : vector<16x32xf32>, vector<32x96xf32>, vector<16x96xf32> -> vector<16x96xf32>
    %c0_4 = arith.constant 0 : index
    %c0_5 = arith.constant 0 : index
    %4 = vector.load %arg3[%c0_4, %c0_5] : memref<1x96xf32, #tpu.memory_space<vmem>>, vector<1x96xf32>
    %5 = vector.broadcast %4 : vector<1x96xf32> to vector<16x96xf32>
    %6 = arith.addf %3, %5 : vector<16x96xf32>
    %7 = vector.extract_strided_slice %6 {offsets = [0, 0], sizes = [8, 8], strides = [1, 1]} : vector<16x96xf32> to vector<8x8xf32>
    %c0_6 = arith.constant 0 : index
    %c0_7 = arith.constant 0 : index
    %c0_8 = arith.constant 0 : index
    %8 = vector.load %arg15[%c0_6, %c0_7, %c0_8] : memref<8x8x8xf32, #tpu.memory_space<vmem>>, vector<1x8x8xf32>
    %9 = vector.shape_cast %8 : vector<1x8x8xf32> to vector<8x8xf32>
    %10 = vector.shape_cast %7 : vector<8x8xf32> to vector<1x8x8xf32>
    tpu.vector_store %arg15[%c0_6, %c0_7, %c0_8], %10 {strides = array<i32>} : memref<8x8x8xf32, #tpu.memory_space<vmem>>, vector<1x8x8xf32>,
    %11 = vector.extract_strided_slice %6 {offsets = [0, 32], sizes = [8, 8], strides = [1, 1]} : vector<16x96xf32> to vector<8x8xf32>
    %c0_9 = arith.constant 0 : index
    %c0_10 = arith.constant 0 : index
    %c0_11 = arith.constant 0 : index
    %12 = vector.load %arg16[%c0_9, %c0_10, %c0_11] : memref<8x8x8xf32, #tpu.memory_space<vmem>>, vector<1x8x8xf32>
    %13 = vector.shape_cast %12 : vector<1x8x8xf32> to vector<8x8xf32>
    %14 = vector.shape_cast %11 : vector<8x8xf32> to vector<1x8x8xf32>
    tpu.vector_store %arg16[%c0_9, %c0_10, %c0_11], %14 {strides = array<i32>} : memref<8x8x8xf32, #tpu.memory_space<vmem>>, vector<1x8x8xf32>,
    %15 = vector.extract_strided_slice %6 {offsets = [0, 64], sizes = [8, 8], strides = [1, 1]} : vector<16x96xf32> to vector<8x8xf32>
    %c0_12 = arith.constant 0 : index
    %c0_13 = arith.constant 0 : index
    %c0_14 = arith.constant 0 : index
    %16 = vector.load %arg17[%c0_12, %c0_13, %c0_14] : memref<8x8x8xf32, #tpu.memory_space<vmem>>, vector<1x8x8xf32>
    %17 = vector.shape_cast %16 : vector<1x8x8xf32> to vector<8x8xf32>
    %18 = vector.shape_cast %15 : vector<8x8xf32> to vector<1x8x8xf32>
    tpu.vector_store %arg17[%c0_12, %c0_13, %c0_14], %18 {strides = array<i32>} : memref<8x8x8xf32, #tpu.memory_space<vmem>>, vector<1x8x8xf32>,
    %19 = vector.extract_strided_slice %6 {offsets = [0, 8], sizes = [8, 8], strides = [1, 1]} : vector<16x96xf32> to vector<8x8xf32>
    %c1 = arith.constant 1 : index
    %c0_15 = arith.constant 0 : index
    %c0_16 = arith.constant 0 : index
    %20 = vector.load %arg15[%c1, %c0_15, %c0_16] : memref<8x8x8xf32, #tpu.memory_space<vmem>>, vector<1x8x8xf32>
    %21 = vector.shape_cast %20 : vector<1x8x8xf32> to vector<8x8xf32>
    %22 = vector.shape_cast %19 : vector<8x8xf32> to vector<1x8x8xf32>
    tpu.vector_store %arg15[%c1, %c0_15, %c0_16], %22 {strides = array<i32>} : memref<8x8x8xf32, #tpu.memory_space<vmem>>, vector<1x8x8xf32>,
    %23 = vector.extract_strided_slice %6 {offsets = [0, 40], sizes = [8, 8], strides = [1, 1]} : vector<16x96xf32> to vector<8x8xf32>
    %c1_17 = arith.constant 1 : index
    %c0_18 = arith.constant 0 : index
    %c0_19 = arith.constant 0 : index
    %24 = vector.load %arg16[%c1_17, %c0_18, %c0_19] : memref<8x8x8xf32, #tpu.memory_space<vmem>>, vector<1x8x8xf32>
    %25 = vector.shape_cast %24 : vector<1x8x8xf32> to vector<8x8xf32>
    %26 = vector.shape_cast %23 : vector<8x8xf32> to vector<1x8x8xf32>
    tpu.vector_store %arg16[%c1_17, %c0_18, %c0_19], %26 {strides = array<i32>} : memref<8x8x8xf32, #tpu.memory_space<vmem>>, vector<1x8x8xf32>,
    %27 = vector.extract_strided_slice %6 {offsets = [0, 72], sizes = [8, 8], strides = [1, 1]} : vector<16x96xf32> to vector<8x8xf32>
    %c1_20 = arith.constant 1 : index
    %c0_21 = arith.constant 0 : index
    %c0_22 = arith.constant 0 : index
    %28 = vector.load %arg17[%c1_20, %c0_21, %c0_22] : memref<8x8x8xf32, #tpu.memory_space<vmem>>, vector<1x8x8xf32>
    %29 = vector.shape_cast %28 : vector<1x8x8xf32> to vector<8x8xf32>
    %30 = vector.shape_cast %27 : vector<8x8xf32> to vector<1x8x8xf32>
    tpu.vector_store %arg17[%c1_20, %c0_21, %c0_22], %30 {strides = array<i32>} : memref<8x8x8xf32, #tpu.memory_space<vmem>>, vector<1x8x8xf32>,
    %31 = vector.extract_strided_slice %6 {offsets = [0, 16], sizes = [8, 8], strides = [1, 1]} : vector<16x96xf32> to vector<8x8xf32>
    %c2 = arith.constant 2 : index
    %c0_23 = arith.constant 0 : index
    %c0_24 = arith.constant 0 : index
    %32 = vector.load %arg15[%c2, %c0_23, %c0_24] : memref<8x8x8xf32, #tpu.memory_space<vmem>>, vector<1x8x8xf32>
    %33 = vector.shape_cast %32 : vector<1x8x8xf32> to vector<8x8xf32>
    %34 = vector.shape_cast %31 : vector<8x8xf32> to vector<1x8x8xf32>
    tpu.vector_store %arg15[%c2, %c0_23, %c0_24], %34 {strides = array<i32>} : memref<8x8x8xf32, #tpu.memory_space<vmem>>, vector<1x8x8xf32>,
    %35 = vector.extract_strided_slice %6 {offsets = [0, 48], sizes = [8, 8], strides = [1, 1]} : vector<16x96xf32> to vector<8x8xf32>
    %c2_25 = arith.constant 2 : index
    %c0_26 = arith.constant 0 : index
    %c0_27 = arith.constant 0 : index
    %36 = vector.load %arg16[%c2_25, %c0_26, %c0_27] : memref<8x8x8xf32, #tpu.memory_space<vmem>>, vector<1x8x8xf32>
    %37 = vector.shape_cast %36 : vector<1x8x8xf32> to vector<8x8xf32>
    %38 = vector.shape_cast %35 : vector<8x8xf32> to vector<1x8x8xf32>
    tpu.vector_store %arg16[%c2_25, %c0_26, %c0_27], %38 {strides = array<i32>} : memref<8x8x8xf32, #tpu.memory_space<vmem>>, vector<1x8x8xf32>,
    %39 = vector.extract_strided_slice %6 {offsets = [0, 80], sizes = [8, 8], strides = [1, 1]} : vector<16x96xf32> to vector<8x8xf32>
    %c2_28 = arith.constant 2 : index
    %c0_29 = arith.constant 0 : index
    %c0_30 = arith.constant 0 : index
    %40 = vector.load %arg17[%c2_28, %c0_29, %c0_30] : memref<8x8x8xf32, #tpu.memory_space<vmem>>, vector<1x8x8xf32>
    %41 = vector.shape_cast %40 : vector<1x8x8xf32> to vector<8x8xf32>
    %42 = vector.shape_cast %39 : vector<8x8xf32> to vector<1x8x8xf32>
    tpu.vector_store %arg17[%c2_28, %c0_29, %c0_30], %42 {strides = array<i32>} : memref<8x8x8xf32, #tpu.memory_space<vmem>>, vector<1x8x8xf32>,
    %43 = vector.extract_strided_slice %6 {offsets = [0, 24], sizes = [8, 8], strides = [1, 1]} : vector<16x96xf32> to vector<8x8xf32>
    %c3 = arith.constant 3 : index
    %c0_31 = arith.constant 0 : index
    %c0_32 = arith.constant 0 : index
    %44 = vector.load %arg15[%c3, %c0_31, %c0_32] : memref<8x8x8xf32, #tpu.memory_space<vmem>>, vector<1x8x8xf32>
    %45 = vector.shape_cast %44 : vector<1x8x8xf32> to vector<8x8xf32>
    %46 = vector.shape_cast %43 : vector<8x8xf32> to vector<1x8x8xf32>
    tpu.vector_store %arg15[%c3, %c0_31, %c0_32], %46 {strides = array<i32>} : memref<8x8x8xf32, #tpu.memory_space<vmem>>, vector<1x8x8xf32>,
    %47 = vector.extract_strided_slice %6 {offsets = [0, 56], sizes = [8, 8], strides = [1, 1]} : vector<16x96xf32> to vector<8x8xf32>
    %c3_33 = arith.constant 3 : index
    %c0_34 = arith.constant 0 : index
    %c0_35 = arith.constant 0 : index
    %48 = vector.load %arg16[%c3_33, %c0_34, %c0_35] : memref<8x8x8xf32, #tpu.memory_space<vmem>>, vector<1x8x8xf32>
    %49 = vector.shape_cast %48 : vector<1x8x8xf32> to vector<8x8xf32>
    %50 = vector.shape_cast %47 : vector<8x8xf32> to vector<1x8x8xf32>
    tpu.vector_store %arg16[%c3_33, %c0_34, %c0_35], %50 {strides = array<i32>} : memref<8x8x8xf32, #tpu.memory_space<vmem>>, vector<1x8x8xf32>,
    %51 = vector.extract_strided_slice %6 {offsets = [0, 88], sizes = [8, 8], strides = [1, 1]} : vector<16x96xf32> to vector<8x8xf32>
    %c3_36 = arith.constant 3 : index
    %c0_37 = arith.constant 0 : index
    %c0_38 = arith.constant 0 : index
    %52 = vector.load %arg17[%c3_36, %c0_37, %c0_38] : memref<8x8x8xf32, #tpu.memory_space<vmem>>, vector<1x8x8xf32>
    %53 = vector.shape_cast %52 : vector<1x8x8xf32> to vector<8x8xf32>
    %54 = vector.shape_cast %51 : vector<8x8xf32> to vector<1x8x8xf32>
    tpu.vector_store %arg17[%c3_36, %c0_37, %c0_38], %54 {strides = array<i32>} : memref<8x8x8xf32, #tpu.memory_space<vmem>>, vector<1x8x8xf32>,
    %55 = vector.extract_strided_slice %6 {offsets = [8, 0], sizes = [8, 8], strides = [1, 1]} : vector<16x96xf32> to vector<8x8xf32>
    %c4 = arith.constant 4 : index
    %c0_39 = arith.constant 0 : index
    %c0_40 = arith.constant 0 : index
    %56 = vector.load %arg15[%c4, %c0_39, %c0_40] : memref<8x8x8xf32, #tpu.memory_space<vmem>>, vector<1x8x8xf32>
    %57 = vector.shape_cast %56 : vector<1x8x8xf32> to vector<8x8xf32>
    %58 = vector.shape_cast %55 : vector<8x8xf32> to vector<1x8x8xf32>
    tpu.vector_store %arg15[%c4, %c0_39, %c0_40], %58 {strides = array<i32>} : memref<8x8x8xf32, #tpu.memory_space<vmem>>, vector<1x8x8xf32>,
    %59 = vector.extract_strided_slice %6 {offsets = [8, 32], sizes = [8, 8], strides = [1, 1]} : vector<16x96xf32> to vector<8x8xf32>
    %c4_41 = arith.constant 4 : index
    %c0_42 = arith.constant 0 : index
    %c0_43 = arith.constant 0 : index
    %60 = vector.load %arg16[%c4_41, %c0_42, %c0_43] : memref<8x8x8xf32, #tpu.memory_space<vmem>>, vector<1x8x8xf32>
    %61 = vector.shape_cast %60 : vector<1x8x8xf32> to vector<8x8xf32>
    %62 = vector.shape_cast %59 : vector<8x8xf32> to vector<1x8x8xf32>
    tpu.vector_store %arg16[%c4_41, %c0_42, %c0_43], %62 {strides = array<i32>} : memref<8x8x8xf32, #tpu.memory_space<vmem>>, vector<1x8x8xf32>,
    %63 = vector.extract_strided_slice %6 {offsets = [8, 64], sizes = [8, 8], strides = [1, 1]} : vector<16x96xf32> to vector<8x8xf32>
    %c4_44 = arith.constant 4 : index
    %c0_45 = arith.constant 0 : index
    %c0_46 = arith.constant 0 : index
    %64 = vector.load %arg17[%c4_44, %c0_45, %c0_46] : memref<8x8x8xf32, #tpu.memory_space<vmem>>, vector<1x8x8xf32>
    %65 = vector.shape_cast %64 : vector<1x8x8xf32> to vector<8x8xf32>
    %66 = vector.shape_cast %63 : vector<8x8xf32> to vector<1x8x8xf32>
    tpu.vector_store %arg17[%c4_44, %c0_45, %c0_46], %66 {strides = array<i32>} : memref<8x8x8xf32, #tpu.memory_space<vmem>>, vector<1x8x8xf32>,
    %67 = vector.extract_strided_slice %6 {offsets = [8, 8], sizes = [8, 8], strides = [1, 1]} : vector<16x96xf32> to vector<8x8xf32>
    %c5 = arith.constant 5 : index
    %c0_47 = arith.constant 0 : index
    %c0_48 = arith.constant 0 : index
    %68 = vector.load %arg15[%c5, %c0_47, %c0_48] : memref<8x8x8xf32, #tpu.memory_space<vmem>>, vector<1x8x8xf32>
    %69 = vector.shape_cast %68 : vector<1x8x8xf32> to vector<8x8xf32>
    %70 = vector.shape_cast %67 : vector<8x8xf32> to vector<1x8x8xf32>
    tpu.vector_store %arg15[%c5, %c0_47, %c0_48], %70 {strides = array<i32>} : memref<8x8x8xf32, #tpu.memory_space<vmem>>, vector<1x8x8xf32>,
    %71 = vector.extract_strided_slice %6 {offsets = [8, 40], sizes = [8, 8], strides = [1, 1]} : vector<16x96xf32> to vector<8x8xf32>
    %c5_49 = arith.constant 5 : index
    %c0_50 = arith.constant 0 : index
    %c0_51 = arith.constant 0 : index
    %72 = vector.load %arg16[%c5_49, %c0_50, %c0_51] : memref<8x8x8xf32, #tpu.memory_space<vmem>>, vector<1x8x8xf32>
    %73 = vector.shape_cast %72 : vector<1x8x8xf32> to vector<8x8xf32>
    %74 = vector.shape_cast %71 : vector<8x8xf32> to vector<1x8x8xf32>
    tpu.vector_store %arg16[%c5_49, %c0_50, %c0_51], %74 {strides = array<i32>} : memref<8x8x8xf32, #tpu.memory_space<vmem>>, vector<1x8x8xf32>,
    %75 = vector.extract_strided_slice %6 {offsets = [8, 72], sizes = [8, 8], strides = [1, 1]} : vector<16x96xf32> to vector<8x8xf32>
    %c5_52 = arith.constant 5 : index
    %c0_53 = arith.constant 0 : index
    %c0_54 = arith.constant 0 : index
    %76 = vector.load %arg17[%c5_52, %c0_53, %c0_54] : memref<8x8x8xf32, #tpu.memory_space<vmem>>, vector<1x8x8xf32>
    %77 = vector.shape_cast %76 : vector<1x8x8xf32> to vector<8x8xf32>
    %78 = vector.shape_cast %75 : vector<8x8xf32> to vector<1x8x8xf32>
    tpu.vector_store %arg17[%c5_52, %c0_53, %c0_54], %78 {strides = array<i32>} : memref<8x8x8xf32, #tpu.memory_space<vmem>>, vector<1x8x8xf32>,
    %79 = vector.extract_strided_slice %6 {offsets = [8, 16], sizes = [8, 8], strides = [1, 1]} : vector<16x96xf32> to vector<8x8xf32>
    %c6 = arith.constant 6 : index
    %c0_55 = arith.constant 0 : index
    %c0_56 = arith.constant 0 : index
    %80 = vector.load %arg15[%c6, %c0_55, %c0_56] : memref<8x8x8xf32, #tpu.memory_space<vmem>>, vector<1x8x8xf32>
    %81 = vector.shape_cast %80 : vector<1x8x8xf32> to vector<8x8xf32>
    %82 = vector.shape_cast %79 : vector<8x8xf32> to vector<1x8x8xf32>
    tpu.vector_store %arg15[%c6, %c0_55, %c0_56], %82 {strides = array<i32>} : memref<8x8x8xf32, #tpu.memory_space<vmem>>, vector<1x8x8xf32>,
    %83 = vector.extract_strided_slice %6 {offsets = [8, 48], sizes = [8, 8], strides = [1, 1]} : vector<16x96xf32> to vector<8x8xf32>
    %c6_57 = arith.constant 6 : index
    %c0_58 = arith.constant 0 : index
    %c0_59 = arith.constant 0 : index
    %84 = vector.load %arg16[%c6_57, %c0_58, %c0_59] : memref<8x8x8xf32, #tpu.memory_space<vmem>>, vector<1x8x8xf32>
    %85 = vector.shape_cast %84 : vector<1x8x8xf32> to vector<8x8xf32>
    %86 = vector.shape_cast %83 : vector<8x8xf32> to vector<1x8x8xf32>
    tpu.vector_store %arg16[%c6_57, %c0_58, %c0_59], %86 {strides = array<i32>} : memref<8x8x8xf32, #tpu.memory_space<vmem>>, vector<1x8x8xf32>,
    %87 = vector.extract_strided_slice %6 {offsets = [8, 80], sizes = [8, 8], strides = [1, 1]} : vector<16x96xf32> to vector<8x8xf32>
    %c6_60 = arith.constant 6 : index
    %c0_61 = arith.constant 0 : index
    %c0_62 = arith.constant 0 : index
    %88 = vector.load %arg17[%c6_60, %c0_61, %c0_62] : memref<8x8x8xf32, #tpu.memory_space<vmem>>, vector<1x8x8xf32>
    %89 = vector.shape_cast %88 : vector<1x8x8xf32> to vector<8x8xf32>
    %90 = vector.shape_cast %87 : vector<8x8xf32> to vector<1x8x8xf32>
    tpu.vector_store %arg17[%c6_60, %c0_61, %c0_62], %90 {strides = array<i32>} : memref<8x8x8xf32, #tpu.memory_space<vmem>>, vector<1x8x8xf32>,
    %91 = vector.extract_strided_slice %6 {offsets = [8, 24], sizes = [8, 8], strides = [1, 1]} : vector<16x96xf32> to vector<8x8xf32>
    %c7 = arith.constant 7 : index
    %c0_63 = arith.constant 0 : index
    %c0_64 = arith.constant 0 : index
    %92 = vector.load %arg15[%c7, %c0_63, %c0_64] : memref<8x8x8xf32, #tpu.memory_space<vmem>>, vector<1x8x8xf32>
    %93 = vector.shape_cast %92 : vector<1x8x8xf32> to vector<8x8xf32>
    %94 = vector.shape_cast %91 : vector<8x8xf32> to vector<1x8x8xf32>
    tpu.vector_store %arg15[%c7, %c0_63, %c0_64], %94 {strides = array<i32>} : memref<8x8x8xf32, #tpu.memory_space<vmem>>, vector<1x8x8xf32>,
    %95 = vector.extract_strided_slice %6 {offsets = [8, 56], sizes = [8, 8], strides = [1, 1]} : vector<16x96xf32> to vector<8x8xf32>
    %c7_65 = arith.constant 7 : index
    %c0_66 = arith.constant 0 : index
    %c0_67 = arith.constant 0 : index
    %96 = vector.load %arg16[%c7_65, %c0_66, %c0_67] : memref<8x8x8xf32, #tpu.memory_space<vmem>>, vector<1x8x8xf32>
    %97 = vector.shape_cast %96 : vector<1x8x8xf32> to vector<8x8xf32>
    %98 = vector.shape_cast %95 : vector<8x8xf32> to vector<1x8x8xf32>
    tpu.vector_store %arg16[%c7_65, %c0_66, %c0_67], %98 {strides = array<i32>} : memref<8x8x8xf32, #tpu.memory_space<vmem>>, vector<1x8x8xf32>,
    %99 = vector.extract_strided_slice %6 {offsets = [8, 88], sizes = [8, 8], strides = [1, 1]} : vector<16x96xf32> to vector<8x8xf32>
    %c7_68 = arith.constant 7 : index
    %c0_69 = arith.constant 0 : index
    %c0_70 = arith.constant 0 : index
    %100 = vector.load %arg17[%c7_68, %c0_69, %c0_70] : memref<8x8x8xf32, #tpu.memory_space<vmem>>, vector<1x8x8xf32>
    %101 = vector.shape_cast %100 : vector<1x8x8xf32> to vector<8x8xf32>
    %102 = vector.shape_cast %99 : vector<8x8xf32> to vector<1x8x8xf32>
    tpu.vector_store %arg17[%c7_68, %c0_69, %c0_70], %102 {strides = array<i32>} : memref<8x8x8xf32, #tpu.memory_space<vmem>>, vector<1x8x8xf32>,
    %c0_71 = arith.constant 0 : index
    %c0_72 = arith.constant 0 : index
    %c0_73 = arith.constant 0 : index
    %103 = vector.load %arg15[%c0_71, %c0_72, %c0_73] : memref<8x8x8xf32, #tpu.memory_space<vmem>>, vector<8x8x8xf32>
    %c0_74 = arith.constant 0 : index
    %c0_75 = arith.constant 0 : index
    %c0_76 = arith.constant 0 : index
    %104 = vector.load %arg16[%c0_74, %c0_75, %c0_76] : memref<8x8x8xf32, #tpu.memory_space<vmem>>, vector<8x8x8xf32>
    %c0_77 = arith.constant 0 : index
    %c0_78 = arith.constant 0 : index
    %c0_79 = arith.constant 0 : index
    %105 = vector.load %arg17[%c0_77, %c0_78, %c0_79] : memref<8x8x8xf32, #tpu.memory_space<vmem>>, vector<8x8x8xf32>
    "tpu.trace_start"() <{level = 10 : i32, message = "glc,gmc->glm"}> : () -> ()
    %cst_80 = arith.constant dense<0.000000e+00> : vector<8x8x8xf32>
    %106 = tpu.matmul %103, %104, %cst_80 {dimension_numbers = #tpu.dot_dimension_numbers<[2], [2], [1], [1], [0, 0, 0, 1, 1, 1], [0], [0]>} : vector<8x8x8xf32>, vector<8x8x8xf32>, vector<8x8x8xf32> -> vector<8x8x8xf32>
    "tpu.trace_stop"() : () -> ()
    %cst_81 = arith.constant dense<0xFF800000> : vector<8x8xf32>
    %107 = vector.multi_reduction <maximumf>, %106, %cst_81 [2] : vector<8x8x8xf32> to vector<8x8xf32>
    %108 = vector.shape_cast %107 : vector<8x8xf32> to vector<8x8x1xf32>
    %109 = vector.broadcast %108 : vector<8x8x1xf32> to vector<8x8x8xf32>
    %110 = arith.subf %106, %109 : vector<8x8x8xf32>
    %111 = math.exp %110 : vector<8x8x8xf32>
    %cst_82 = arith.constant dense<0.000000e+00> : vector<8x8xf32>
    %112 = vector.multi_reduction <add>, %111, %cst_82 [2] : vector<8x8x8xf32> to vector<8x8xf32>
    %113 = vector.shape_cast %112 : vector<8x8xf32> to vector<8x8x1xf32>
    %114 = tpu.reciprocal %113 {approx = true} : vector<8x8x1xf32> -> vector<8x8x1xf32>
    %115 = vector.broadcast %114 : vector<8x8x1xf32> to vector<8x8x8xf32>
    %116 = arith.mulf %111, %115 : vector<8x8x8xf32>
    "tpu.trace_start"() <{level = 10 : i32, message = "glm,gmc->glc"}> : () -> ()
    %cst_83 = arith.constant dense<0.000000e+00> : vector<8x8x8xf32>
    %117 = tpu.matmul %116, %105, %cst_83 {dimension_numbers = #tpu.dot_dimension_numbers<[2], [1], [1], [2], [0, 0, 0, 1, 1, 2], [0], [0]>} : vector<8x8x8xf32>, vector<8x8x8xf32>, vector<8x8x8xf32> -> vector<8x8x8xf32>
    "tpu.trace_stop"() : () -> ()
    %118 = vector.extract_strided_slice %117 {offsets = [0, 0, 0], sizes = [1, 8, 8], strides = [1, 1, 1]} : vector<8x8x8xf32> to vector<1x8x8xf32>
    %119 = vector.shape_cast %118 : vector<1x8x8xf32> to vector<8x8xf32>
    %c0_84 = arith.constant 0 : index
    %c0_85 = arith.constant 0 : index
    %120 = vector.load %arg18[%c0_84, %c0_85] : memref<16x32xf32, #tpu.memory_space<vmem>>, vector<8x8xf32>
    tpu.vector_store %arg18[%c0_84, %c0_85], %119 {strides = array<i32>} : memref<16x32xf32, #tpu.memory_space<vmem>>, vector<8x8xf32>,
    %121 = vector.extract_strided_slice %117 {offsets = [1, 0, 0], sizes = [1, 8, 8], strides = [1, 1, 1]} : vector<8x8x8xf32> to vector<1x8x8xf32>
    %122 = vector.shape_cast %121 : vector<1x8x8xf32> to vector<8x8xf32>
    %c0_86 = arith.constant 0 : index
    %c8 = arith.constant 8 : index
    %123 = vector.load %arg18[%c0_86, %c8] : memref<16x32xf32, #tpu.memory_space<vmem>>, vector<8x8xf32>
    tpu.vector_store %arg18[%c0_86, %c8], %122 {strides = array<i32>} : memref<16x32xf32, #tpu.memory_space<vmem>>, vector<8x8xf32>,
    %124 = vector.extract_strided_slice %117 {offsets = [2, 0, 0], sizes = [1, 8, 8], strides = [1, 1, 1]} : vector<8x8x8xf32> to vector<1x8x8xf32>
    %125 = vector.shape_cast %124 : vector<1x8x8xf32> to vector<8x8xf32>
    %c0_87 = arith.constant 0 : index
    %c16 = arith.constant 16 : index
    %126 = vector.load %arg18[%c0_87, %c16] : memref<16x32xf32, #tpu.memory_space<vmem>>, vector<8x8xf32>
    tpu.vector_store %arg18[%c0_87, %c16], %125 {strides = array<i32>} : memref<16x32xf32, #tpu.memory_space<vmem>>, vector<8x8xf32>,
    %127 = vector.extract_strided_slice %117 {offsets = [3, 0, 0], sizes = [1, 8, 8], strides = [1, 1, 1]} : vector<8x8x8xf32> to vector<1x8x8xf32>
    %128 = vector.shape_cast %127 : vector<1x8x8xf32> to vector<8x8xf32>
    %c0_88 = arith.constant 0 : index
    %c24 = arith.constant 24 : index
    %129 = vector.load %arg18[%c0_88, %c24] : memref<16x32xf32, #tpu.memory_space<vmem>>, vector<8x8xf32>
    tpu.vector_store %arg18[%c0_88, %c24], %128 {strides = array<i32>} : memref<16x32xf32, #tpu.memory_space<vmem>>, vector<8x8xf32>,
    %130 = vector.extract_strided_slice %117 {offsets = [4, 0, 0], sizes = [1, 8, 8], strides = [1, 1, 1]} : vector<8x8x8xf32> to vector<1x8x8xf32>
    %131 = vector.shape_cast %130 : vector<1x8x8xf32> to vector<8x8xf32>
    %c8_89 = arith.constant 8 : index
    %c0_90 = arith.constant 0 : index
    %132 = vector.load %arg18[%c8_89, %c0_90] : memref<16x32xf32, #tpu.memory_space<vmem>>, vector<8x8xf32>
    tpu.vector_store %arg18[%c8_89, %c0_90], %131 {strides = array<i32>} : memref<16x32xf32, #tpu.memory_space<vmem>>, vector<8x8xf32>,
    %133 = vector.extract_strided_slice %117 {offsets = [5, 0, 0], sizes = [1, 8, 8], strides = [1, 1, 1]} : vector<8x8x8xf32> to vector<1x8x8xf32>
    %134 = vector.shape_cast %133 : vector<1x8x8xf32> to vector<8x8xf32>
    %c8_91 = arith.constant 8 : index
    %c8_92 = arith.constant 8 : index
    %135 = vector.load %arg18[%c8_91, %c8_92] : memref<16x32xf32, #tpu.memory_space<vmem>>, vector<8x8xf32>
    tpu.vector_store %arg18[%c8_91, %c8_92], %134 {strides = array<i32>} : memref<16x32xf32, #tpu.memory_space<vmem>>, vector<8x8xf32>,
    %136 = vector.extract_strided_slice %117 {offsets = [6, 0, 0], sizes = [1, 8, 8], strides = [1, 1, 1]} : vector<8x8x8xf32> to vector<1x8x8xf32>
    %137 = vector.shape_cast %136 : vector<1x8x8xf32> to vector<8x8xf32>
    %c8_93 = arith.constant 8 : index
    %c16_94 = arith.constant 16 : index
    %138 = vector.load %arg18[%c8_93, %c16_94] : memref<16x32xf32, #tpu.memory_space<vmem>>, vector<8x8xf32>
    tpu.vector_store %arg18[%c8_93, %c16_94], %137 {strides = array<i32>} : memref<16x32xf32, #tpu.memory_space<vmem>>, vector<8x8xf32>,
    %139 = vector.extract_strided_slice %117 {offsets = [7, 0, 0], sizes = [1, 8, 8], strides = [1, 1, 1]} : vector<8x8x8xf32> to vector<1x8x8xf32>
    %140 = vector.shape_cast %139 : vector<1x8x8xf32> to vector<8x8xf32>
    %c8_95 = arith.constant 8 : index
    %c24_96 = arith.constant 24 : index
    %141 = vector.load %arg18[%c8_95, %c24_96] : memref<16x32xf32, #tpu.memory_space<vmem>>, vector<8x8xf32>
    tpu.vector_store %arg18[%c8_95, %c24_96], %140 {strides = array<i32>} : memref<16x32xf32, #tpu.memory_space<vmem>>, vector<8x8xf32>,
    %c0_97 = arith.constant 0 : index
    %c0_98 = arith.constant 0 : index
    %142 = vector.load %arg18[%c0_97, %c0_98] : memref<16x32xf32, #tpu.memory_space<vmem>>, vector<16x32xf32>
    %c0_99 = arith.constant 0 : index
    %c0_100 = arith.constant 0 : index
    %143 = vector.load %arg4[%c0_99, %c0_100] : memref<32x32xf32, #tpu.memory_space<vmem>>, vector<32x32xf32>
    %cst_101 = arith.constant dense<0.000000e+00> : vector<16x32xf32>
    %144 = tpu.matmul %142, %143, %cst_101 {dimension_numbers = #tpu.dot_dimension_numbers<[1], [0], [0], [1], [0, 0, 1, 1], [], []>} : vector<16x32xf32>, vector<32x32xf32>, vector<16x32xf32> -> vector<16x32xf32>
    %c0_102 = arith.constant 0 : index
    %c0_103 = arith.constant 0 : index
    %145 = vector.load %arg5[%c0_102, %c0_103] : memref<1x32xf32, #tpu.memory_space<vmem>>, vector<1x32xf32>
    %146 = vector.broadcast %145 : vector<1x32xf32> to vector<16x32xf32>
    %147 = arith.addf %144, %146 : vector<16x32xf32>
    %148 = arith.addf %1, %147 : vector<16x32xf32>
    %c0_104 = arith.constant 0 : index
    %c0_105 = arith.constant 0 : index
    %149 = vector.load %arg10[%c0_104, %c0_105] : memref<1x32xf32, #tpu.memory_space<vmem>>, vector<1x32xf32>
    %c0_106 = arith.constant 0 : index
    %c0_107 = arith.constant 0 : index
    %150 = vector.load %arg11[%c0_106, %c0_107] : memref<1x32xf32, #tpu.memory_space<vmem>>, vector<1x32xf32>
    %cst_108 = arith.constant dense<0.000000e+00> : vector<16xf32>
    %151 = vector.multi_reduction <add>, %148, %cst_108 [1] : vector<16x32xf32> to vector<16xf32>
    %152 = vector.shape_cast %151 : vector<16xf32> to vector<16x1xf32>
    %cst_109 = arith.constant 3.200000e+01 : f32
    %153 = vector.broadcast %cst_109 : f32 to vector<16x1xf32>
    %154 = arith.divf %152, %153 : vector<16x1xf32>
    %155 = vector.broadcast %154 : vector<16x1xf32> to vector<16x32xf32>
    %156 = arith.subf %148, %155 : vector<16x32xf32>
    %157 = arith.mulf %156, %156 : vector<16x32xf32>
    %cst_110 = arith.constant dense<0.000000e+00> : vector<16xf32>
    %158 = vector.multi_reduction <add>, %157, %cst_110 [1] : vector<16x32xf32> to vector<16xf32>
    %159 = vector.shape_cast %158 : vector<16xf32> to vector<16x1xf32>
    %cst_111 = arith.constant 3.200000e+01 : f32
    %160 = vector.broadcast %cst_111 : f32 to vector<16x1xf32>
    %161 = arith.divf %159, %160 : vector<16x1xf32>
    %162 = vector.broadcast %154 : vector<16x1xf32> to vector<16x32xf32>
    %163 = arith.subf %148, %162 : vector<16x32xf32>
    %cst_112 = arith.constant 9.99999974E-6 : f32
    %164 = vector.broadcast %cst_112 : f32 to vector<16x1xf32>
    %165 = arith.addf %161, %164 : vector<16x1xf32>
    %166 = math.rsqrt %165 : vector<16x1xf32>
    %167 = vector.broadcast %166 : vector<16x1xf32> to vector<16x32xf32>
    %168 = arith.mulf %163, %167 : vector<16x32xf32>
    %169 = vector.broadcast %149 : vector<1x32xf32> to vector<16x32xf32>
    %170 = arith.mulf %168, %169 : vector<16x32xf32>
    %171 = vector.broadcast %150 : vector<1x32xf32> to vector<16x32xf32>
    %172 = arith.addf %170, %171 : vector<16x32xf32>
    %c0_113 = arith.constant 0 : index
    %c0_114 = arith.constant 0 : index
    %173 = vector.load %arg6[%c0_113, %c0_114] : memref<32x64xf32, #tpu.memory_space<vmem>>, vector<32x64xf32>
    %cst_115 = arith.constant dense<0.000000e+00> : vector<16x64xf32>
    %174 = tpu.matmul %172, %173, %cst_115 {dimension_numbers = #tpu.dot_dimension_numbers<[1], [0], [0], [1], [0, 0, 1, 1], [], []>} : vector<16x32xf32>, vector<32x64xf32>, vector<16x64xf32> -> vector<16x64xf32>
    %c0_116 = arith.constant 0 : index
    %c0_117 = arith.constant 0 : index
    %175 = vector.load %arg7[%c0_116, %c0_117] : memref<1x64xf32, #tpu.memory_space<vmem>>, vector<1x64xf32>
    %176 = vector.broadcast %175 : vector<1x64xf32> to vector<16x64xf32>
    %177 = arith.addf %174, %176 : vector<16x64xf32>
    %cst_118 = arith.constant 0.000000e+00 : f32
    %178 = vector.broadcast %cst_118 : f32 to vector<16x64xf32>
    %179 = arith.maximumf %177, %178 : vector<16x64xf32>
    %c0_119 = arith.constant 0 : index
    %c0_120 = arith.constant 0 : index
    %180 = vector.load %arg8[%c0_119, %c0_120] : memref<64x32xf32, #tpu.memory_space<vmem>>, vector<64x32xf32>
    %cst_121 = arith.constant dense<0.000000e+00> : vector<16x32xf32>
    %181 = tpu.matmul %179, %180, %cst_121 {dimension_numbers = #tpu.dot_dimension_numbers<[1], [0], [0], [1], [0, 0, 1, 1], [], []>} : vector<16x64xf32>, vector<64x32xf32>, vector<16x32xf32> -> vector<16x32xf32>
    %c0_122 = arith.constant 0 : index
    %c0_123 = arith.constant 0 : index
    %182 = vector.load %arg9[%c0_122, %c0_123] : memref<1x32xf32, #tpu.memory_space<vmem>>, vector<1x32xf32>
    %183 = vector.broadcast %182 : vector<1x32xf32> to vector<16x32xf32>
    %184 = arith.addf %181, %183 : vector<16x32xf32>
    %185 = arith.addf %172, %184 : vector<16x32xf32>
    %c0_124 = arith.constant 0 : index
    %c0_125 = arith.constant 0 : index
    %186 = vector.load %arg12[%c0_124, %c0_125] : memref<1x32xf32, #tpu.memory_space<vmem>>, vector<1x32xf32>
    %c0_126 = arith.constant 0 : index
    %c0_127 = arith.constant 0 : index
    %187 = vector.load %arg13[%c0_126, %c0_127] : memref<1x32xf32, #tpu.memory_space<vmem>>, vector<1x32xf32>
    %cst_128 = arith.constant dense<0.000000e+00> : vector<16xf32>
    %188 = vector.multi_reduction <add>, %185, %cst_128 [1] : vector<16x32xf32> to vector<16xf32>
    %189 = vector.shape_cast %188 : vector<16xf32> to vector<16x1xf32>
    %cst_129 = arith.constant 3.200000e+01 : f32
    %190 = vector.broadcast %cst_129 : f32 to vector<16x1xf32>
    %191 = arith.divf %189, %190 : vector<16x1xf32>
    %192 = vector.broadcast %191 : vector<16x1xf32> to vector<16x32xf32>
    %193 = arith.subf %185, %192 : vector<16x32xf32>
    %194 = arith.mulf %193, %193 : vector<16x32xf32>
    %cst_130 = arith.constant dense<0.000000e+00> : vector<16xf32>
    %195 = vector.multi_reduction <add>, %194, %cst_130 [1] : vector<16x32xf32> to vector<16xf32>
    %196 = vector.shape_cast %195 : vector<16xf32> to vector<16x1xf32>
    %cst_131 = arith.constant 3.200000e+01 : f32
    %197 = vector.broadcast %cst_131 : f32 to vector<16x1xf32>
    %198 = arith.divf %196, %197 : vector<16x1xf32>
    %199 = vector.broadcast %191 : vector<16x1xf32> to vector<16x32xf32>
    %200 = arith.subf %185, %199 : vector<16x32xf32>
    %cst_132 = arith.constant 9.99999974E-6 : f32
    %201 = vector.broadcast %cst_132 : f32 to vector<16x1xf32>
    %202 = arith.addf %198, %201 : vector<16x1xf32>
    %203 = math.rsqrt %202 : vector<16x1xf32>
    %204 = vector.broadcast %203 : vector<16x1xf32> to vector<16x32xf32>
    %205 = arith.mulf %200, %204 : vector<16x32xf32>
    %206 = vector.broadcast %186 : vector<1x32xf32> to vector<16x32xf32>
    %207 = arith.mulf %205, %206 : vector<16x32xf32>
    %208 = vector.broadcast %187 : vector<1x32xf32> to vector<16x32xf32>
    %209 = arith.addf %207, %208 : vector<16x32xf32>
    %210 = vector.shape_cast %209 : vector<16x32xf32> to vector<2x8x32xf32>
    %c0_133 = arith.constant 0 : index
    %c0_134 = arith.constant 0 : index
    %c0_135 = arith.constant 0 : index
    %211 = vector.load %arg14[%c0_133, %c0_134, %c0_135] : memref<2x8x32xf32, #tpu.memory_space<vmem>>, vector<2x8x32xf32>
    tpu.vector_store %arg14[%c0_133, %c0_134, %c0_135], %210 {strides = array<i32>} : memref<2x8x32xf32, #tpu.memory_space<vmem>>, vector<2x8x32xf32>,
    return
  }
  func.func @transform_0(%arg0: i32) -> (i32, i32, i32) {
    %c0_i32 = arith.constant 0 : i32
    %c0_i32_0 = arith.constant 0 : i32
    %c0_i32_1 = arith.constant 0 : i32
    return %arg0, %c0_i32, %c0_i32_0 : i32, i32, i32
  }
  func.func @transform_1(%arg0: i32) -> (i32, i32) {
    %c0_i32 = arith.constant 0 : i32
    %c0_i32_0 = arith.constant 0 : i32
    %c0_i32_1 = arith.constant 0 : i32
    return %c0_i32, %c0_i32_0 : i32, i32
  }
  func.func @transform_2(%arg0: i32) -> (i32, i32) {
    %c0_i32 = arith.constant 0 : i32
    %c0_i32_0 = arith.constant 0 : i32
    %c0_i32_1 = arith.constant 0 : i32
    return %c0_i32, %c0_i32_0 : i32, i32
  }
  func.func @transform_3(%arg0: i32) -> (i32, i32) {
    %c0_i32 = arith.constant 0 : i32
    %c0_i32_0 = arith.constant 0 : i32
    %c0_i32_1 = arith.constant 0 : i32
    return %c0_i32, %c0_i32_0 : i32, i32
  }
  func.func @transform_4(%arg0: i32) -> (i32, i32) {
    %c0_i32 = arith.constant 0 : i32
    %c0_i32_0 = arith.constant 0 : i32
    %c0_i32_1 = arith.constant 0 : i32
    return %c0_i32, %c0_i32_0 : i32, i32
  }
  func.func @transform_5(%arg0: i32) -> (i32, i32) {
    %c0_i32 = arith.constant 0 : i32
    %c0_i32_0 = arith.constant 0 : i32
    %c0_i32_1 = arith.constant 0 : i32
    return %c0_i32, %c0_i32_0 : i32, i32
  }
  func.func @transform_6(%arg0: i32) -> (i32, i32) {
    %c0_i32 = arith.constant 0 : i32
    %c0_i32_0 = arith.constant 0 : i32
    %c0_i32_1 = arith.constant 0 : i32
    return %c0_i32, %c0_i32_0 : i32, i32
  }
  func.func @transform_7(%arg0: i32) -> (i32, i32) {
    %c0_i32 = arith.constant 0 : i32
    %c0_i32_0 = arith.constant 0 : i32
    %c0_i32_1 = arith.constant 0 : i32
    return %c0_i32, %c0_i32_0 : i32, i32
  }
  func.func @transform_8(%arg0: i32) -> (i32, i32) {
    %c0_i32 = arith.constant 0 : i32
    %c0_i32_0 = arith.constant 0 : i32
    %c0_i32_1 = arith.constant 0 : i32
    return %c0_i32, %c0_i32_0 : i32, i32
  }
  func.func @transform_9(%arg0: i32) -> (i32, i32) {
    %c0_i32 = arith.constant 0 : i32
    %c0_i32_0 = arith.constant 0 : i32
    %c0_i32_1 = arith.constant 0 : i32
    return %c0_i32, %c0_i32_0 : i32, i32
  }
  func.func @transform_10(%arg0: i32) -> (i32, i32) {
    %c0_i32 = arith.constant 0 : i32
    %c0_i32_0 = arith.constant 0 : i32
    %c0_i32_1 = arith.constant 0 : i32
    return %c0_i32, %c0_i32_0 : i32, i32
  }
  func.func @transform_11(%arg0: i32) -> (i32, i32) {
    %c0_i32 = arith.constant 0 : i32
    %c0_i32_0 = arith.constant 0 : i32
    %c0_i32_1 = arith.constant 0 : i32
    return %c0_i32, %c0_i32_0 : i32, i32
  }
  func.func @transform_12(%arg0: i32) -> (i32, i32) {
    %c0_i32 = arith.constant 0 : i32
    %c0_i32_0 = arith.constant 0 : i32
    %c0_i32_1 = arith.constant 0 : i32
    return %c0_i32, %c0_i32_0 : i32, i32
  }
  func.func @transform_13(%arg0: i32) -> (i32, i32, i32) {
    %c0_i32 = arith.constant 0 : i32
    %c0_i32_0 = arith.constant 0 : i32
    %c0_i32_1 = arith.constant 0 : i32
    return %arg0, %c0_i32, %c0_i32_0 : i32, i32, i32
  }
}

</mosaic_0001>

<bundles_post_ra>
// kernel: tpu_custom_call.1
= control target key start
LH: loop header
LB: loop body
LE: loop exit
PB: predicated region body
PF: predicated region fallthrough
CT: control target
= control target key end

     0   :  { %18 = vsyncpa [#allocation7], 0  ;;  %s2790_s0 = inlined_call_operand.hbm [shape: f32[2,8,32], index: 0, kind: input, shape index: {}]   ;;  %s2791_s1 = inlined_call_operand.vmem [shape: f32[32,96], index: 1, kind: input, shape index: {}]   ;;  %s2792_s2 = inlined_call_operand.vmem [shape: f32[1,96], index: 2, kind: input, shape index: {}]   ;;  %s2793_s3 = inlined_call_operand.vmem [shape: f32[32,32], index: 3, kind: input, shape index: {}]   ;;  %s2794_s4 = inlined_call_operand.vmem [shape: f32[1,32], index: 4, kind: input, shape index: {}]   ;;  %s2795_s5 = inlined_call_operand.vmem [shape: f32[32,64], index: 5, kind: input, shape index: {}]   ;;  %s2796_s6 = inlined_call_operand.vmem [shape: f32[1,64], index: 6, kind: input, shape index: {}]   ;;  %s2797_s7 = inlined_call_operand.vmem [shape: f32[64,32], index: 7, kind: input, shape index: {}]   ;;  %s2798_s8 = inlined_call_operand.vmem [shape: f32[1,32], index: 8, kind: input, shape index: {}]   ;;  %s2799_s9 = inlined_call_operand.vmem [shape: f32[1,32], index: 9, kind: input, shape index: {}]   ;;  %s2800_s10 = inlined_call_operand.vmem [shape: f32[1,32], index: 10, kind: input, shape index: {}]   ;;  %s2801_s11 = inlined_call_operand.vmem [shape: f32[1,32], index: 11, kind: input, shape index: {}]   ;;  %s2802_s12 = inlined_call_operand.vmem [shape: f32[1,32], index: 12, kind: input, shape index: {}]   ;;  %s2803_s13 = inlined_call_operand.hbm [shape: f32[2,8,32], index: 13, kind: output, shape index: {}]  }
   0x1   :  { %19 = vsyncpa [#allocation8], 0  ;;  %s2383_s25 = smov [#allocation6]   ;;  %s2335_s29 = scalar_lea.hbm %s2790_s0, 256 }
   0x2   :  { %s25_s26 = sshll.u32 %s2383_s25, 4  ;;  %p2336_p0 = scmp.ne.s32.totalorder %s2790_s0, %s2335_s29  ;;  %s26_s26 = int_to_ptr.vmem [resolvable:$true] %s25_s26 }
   0x3   :  { %p2339_p1 = scmp.lt.u32.totalorder %s2335_s29, %s2790_s0 }
   0x5   :  { %p2341_p2 = pnand %p2339_p1, %p2336_p0 }
   0x7   :  { %2344 = shalt.err (!%p2341_p2)
}
   0x8   :  { %s2345_s17 = scalar_lea.vmem %s26_s26, 256  ;;  %p2350_p4 = scmp.lt.s32.totalorder %s26_s26, %s26_s26 }
   0x9   :  { %p2346_p3 = scmp.ne.s32.totalorder %s26_s26, %s2345_s17  ;;  %p2351_p5 = scmp.lt.s32.totalorder %s2345_s17, %s2345_s17 }
   0xb   :  { %p2352_p6 = por %p2351_p5, %p2350_p4 }
   0xd   :  { %p2353_p7 = pnand %p2352_p6, %p2346_p3 }
   0xf   :  { %2356 = shalt.err (!%p2353_p7)
}
  0x10   :  { %s2384_s18 = smov 128   ;;  %s2385_s19 = smov 8  }
  0x11   :  { %31 = dma.hbm_to_vmem [thread:$0]  %s2790_s0, 256, %s26_s26, [#allocation7], %s2384_s18, %s2384_s18, %s2385_s19  }
  0x12   :  { %2379 = dma.done.wait [#allocation7], 256  }
  0x13   :  { %2380 = vsyncadd [#allocation7], 4294967040  ;;  %vm72_vm0 = vcmask 261120   ;;  %v61_v0 = vld [vmem:[%s2791_s1] sm:$0xff]  ;;  %v62_v1 = vld [vmem:[%s2791_s1 + $0x8] sm:$0xff]  ;;  %v2386_v9 = vmov 0.0  }
  0x14   :  { %v63_v2 = vld [vmem:[%s2791_s1 + $0x10] sm:$0xff]  ;;  %v2236_v3 = vpack.c.bf16 %v62_v1, %v61_v0  ;;  %v64_v4 = vld [vmem:[%s2791_s1 + $0x18] sm:$0xff]  ;;  %v2004_v8 = vld [vmem:[%s2792_s2] ss:$0 sm:$0xff]  ;;  %2125 = vmatprep.subr.mxu0 %v2386_v9  ;;  %vm154_vm1 = vcmask 64512   ;;  %s2387_s1 = smov 88  }
  0x15   :  { %v2499_v5 = vld [vmem:[#allocation6] sm:$0xff]  ;;  %v2240_v6 = vpack.c.bf16 %v64_v4, %v63_v2  ;;  %v2503_v7 = vld [vmem:[#allocation6 + $0x8] sm:$0xff]  ;;  %s2388_s14 = smov 96   ;;  %vm2389_vm2 = vmmov 0   ;;  %s2390_s2 = smov 120   ;;  %vm1577_vm3 = vcmask 130112  }
  0x16   :  { %2112 = vmatprep.mubr.msk.f32.mxu1 %vm72_vm0, %v2499_v5  ;;  %2237 = vmatprep.subr.bf16.mxu1 %v2236_v3  ;;  %s2391_s15 = smov 80   ;;  %s2392_s16 = smov 112   ;;  %vm1583_vm4 = vcmask 195712   ;;  %vm1589_vm5 = vcmask 261312   ;;  %vm1857_vm6 = vcmask 523264  }
  0x17   :  { %2239 = vmatpush3.bf16.msra.mxu1 %v2236_v3  ;;  %2127 = vmatprep.mubr.msk.f32.mxu0 %vm2389_vm2, %v2386_v9  ;;  %s2393_s17 = smov 72   ;;  %s2394_s20 = smov 104  }
  0x18   :  { %2241 = vmatprep.subr.bf16.mxu1 %v2240_v6  ;;  %s2395_s21 = smov 64   ;;  %s2396_s22 = smov 48  }
  0x19   :  { %s2397_s23 = smov 56   ;;  %s2398_s24 = smov 40  }
  0x1a   :  { %s2399_s30 = smov 16   ;;  %s2401_s28 = smov [#allocation9]  }
  0x1b   :  { %2243 = vmatpush3.bf16.msra.mxu1 %v2240_v6  ;;  %s1992_s29 = sshll.u32 %s2401_s28, 4  ;;  %s1993_s29 = int_to_ptr.vmem [resolvable:$true] %s1992_s29 }
  0x1c   :  { %2115 = vmatprep.subr.mxu1 %v2386_v9  ;;  %p2362_p9 = scmp.lt.s32.totalorder %s1993_s29, %s1993_s29 }
  0x1e   :  { %2113 = vmatmul.mubr.msk.f32.vlgmr.msra.gmra.mrb[0].mxu1 %vm72_vm0, %v2503_v7 }
  0x1f   :  { %2117 = vmatprep.mubr.msk.f32.mxu1 %vm2389_vm2, %v2386_v9 }
  0xf1   :  { %v2114_v10 = vpop.f32.mrb[0].mxu1 }
  0xf2   :  { %v2512_v11 = vadd.f32 %v2114_v10, %v2004_v8  ;;  %v145_v12 = vpop.f32.mrb[1].mxu1 }
  0xf3   :  { %v2514_v13 = vadd.f32 %v2004_v8, %v145_v12 }
  0xf4   :  { %228 = vrot.lane.b32.xlu0 %v2512_v11, %s2387_s1  ;;  %213 = vrot.lane.b32.xlu1 %v2512_v11, %s2388_s14  ;;  %211 = vst.msk [vmem:[#allocation2 + $0x20] sm:$0xff] %vm154_vm1, %v2512_v11 }
  0xf5   :  { %155 = vst.msk [vmem:[#allocation2] sm:$0xff] %vm154_vm1, %v2514_v13 }
  0xf8   :  { %165 = vrot.lane.b32.xlu1 %v2514_v13, %s2390_s2  ;;  %157 = vrot.lane.b32.xlu0 %v2514_v13, %s2388_s14 }
  0xfb   :  { %v272_v37 = vld [vmem:[#allocation2 + $0x20] sm:$0xff] }
  0xfc   :  { %185 = vrot.lane.b32.xlu1 %v2514_v13, %s2391_s15  ;;  %170 = vrot.lane.b32.xlu0 %v2514_v13, %s2387_s1  ;;  %v268_v23 = vld [vmem:[#allocation2] sm:$0xff] }
 0x100   :  { %180 = vrot.lane.b32.xlu1 %v2514_v13, %s2392_s16  ;;  %200 = vrot.lane.b32.xlu0 %v2514_v13, %s2393_s17 }
 0x104   :  { %223 = vrot.lane.b32.xlu1 %v2512_v11, %s2390_s2  ;;  %195 = vrot.lane.b32.xlu0 %v2514_v13, %s2394_s20  ;;  %s2400_s2 = smov 24  }
 0x108   :  { %258 = vrot.lane.b32.xlu1 %v2512_v11, %s2393_s17  ;;  %243 = vrot.lane.b32.xlu0 %v2512_v11, %s2391_s15 }
 0x10c   :  { %253 = vrot.lane.b32.xlu1 %v2512_v11, %s2394_s20  ;;  %238 = vrot.lane.b32.xlu0 %v2512_v11, %s2392_s16 }
 0x166   :  { %v229_v14 = vpop.permute.xlu0 %228  ;;  %v214_v15 = vpop.permute.xlu1 %213 }
 0x167   :  { %232 = vst.msk [vmem:[#allocation3 + $0x28] sm:$0xff] %vm154_vm1, %v229_v14  ;;  %217 = vst.msk [vmem:[#allocation3 + $0x20] sm:$0xff] %vm154_vm1, %v214_v15 }
 0x16a   :  { %v166_v16 = vpop.permute.xlu1 %165  ;;  %v158_v17 = vpop.permute.xlu0 %157 }
 0x16b   :  { %169 = vst.msk [vmem:[#allocation2 + $0x8] sm:$0xff] %vm154_vm1, %v166_v16  ;;  %160 = vst.msk [vmem:[#allocation3] sm:$0xff] %vm154_vm1, %v158_v17 }
 0x16e   :  { %v186_v18 = vpop.permute.xlu1 %185  ;;  %v171_v19 = vpop.permute.xlu0 %170  ;;  %v280_v33 = vld [vmem:[#allocation3 + $0x20] sm:$0xff]  ;;  %v281_v38 = vld [vmem:[#allocation3 + $0x28] sm:$0xff] }
 0x16f   :  { %189 = vst.msk [vmem:[#allocation3 + $0x10] sm:$0xff] %vm154_vm1, %v186_v18  ;;  %174 = vst.msk [vmem:[#allocation3 + $0x8] sm:$0xff] %vm154_vm1, %v171_v19 }
 0x172   :  { %v181_v20 = vpop.permute.xlu1 %180  ;;  %v201_v21 = vpop.permute.xlu0 %200  ;;  %v276_v22 = vld [vmem:[#allocation3] sm:$0xff]  ;;  %v269_v28 = vld [vmem:[#allocation2 + $0x8] sm:$0xff] }
 0x173   :  { %184 = vst.msk [vmem:[#allocation2 + $0x10] sm:$0xff] %vm154_vm1, %v181_v20  ;;  %204 = vst.msk [vmem:[#allocation3 + $0x18] sm:$0xff] %vm154_vm1, %v201_v21  ;;  %2116 = vmatpush3.xpose.msk.msra.mxu1 %vm154_vm1, %v276_v22 }
 0x174   :  { %2120 = vmatprep.subr.mxu1 %v2386_v9 }
 0x176   :  { %v224_v24 = vpop.permute.xlu1 %223  ;;  %v196_v25 = vpop.permute.xlu0 %195  ;;  %2118 = vmatmul.mubr.msk.f32.vlgmr.msra.gmra.mrb[2].mxu1 %vm154_vm1, %v268_v23  ;;  %v277_v26 = vld [vmem:[#allocation3 + $0x8] sm:$0xff]  ;;  %v278_v27 = vld [vmem:[#allocation3 + $0x10] sm:$0xff] }
 0x177   :  { %227 = vst.msk [vmem:[#allocation2 + $0x28] sm:$0xff] %vm154_vm1, %v224_v24  ;;  %199 = vst.msk [vmem:[#allocation2 + $0x18] sm:$0xff] %vm154_vm1, %v196_v25  ;;  %2121 = vmatpush3.xpose.msk.msra.mxu1 %vm154_vm1, %v277_v26  ;;  %2126 = vmatpush3.xpose.msk.msra.mxu0 %vm154_vm1, %v278_v27 }
 0x178   :  { %2122 = vmatprep.mubr.msk.f32.mxu1 %vm2389_vm2, %v2386_v9  ;;  %2135 = vmatprep.subr.mxu0 %v2386_v9 }
 0x179   :  { %2130 = vmatprep.subr.mxu1 %v2386_v9 }
 0x17a   :  { %v259_v29 = vpop.permute.xlu1 %258  ;;  %v244_v30 = vpop.permute.xlu0 %243  ;;  %2123 = vmatmul.mubr.msk.f32.vlgmr.msra.gmra.mrb[4].mxu1 %vm154_vm1, %v269_v28  ;;  %v270_v31 = vld [vmem:[#allocation2 + $0x10] sm:$0xff]  ;;  %v279_v32 = vld [vmem:[#allocation3 + $0x18] sm:$0xff] }
 0x17b   :  { %262 = vst.msk [vmem:[#allocation3 + $0x38] sm:$0xff] %vm154_vm1, %v259_v29  ;;  %247 = vst.msk [vmem:[#allocation3 + $0x30] sm:$0xff] %vm154_vm1, %v244_v30  ;;  %2128 = vmatmul.mubr.msk.f32.vlgmr.msra.gmra.mrb[0].mxu0 %vm154_vm1, %v270_v31  ;;  %2131 = vmatpush3.xpose.msk.msra.mxu1 %vm154_vm1, %v279_v32 }
 0x17c   :  { %2136 = vmatpush3.xpose.msk.msra.mxu0 %vm154_vm1, %v280_v33  ;;  %2137 = vmatprep.mubr.msk.f32.mxu0 %vm2389_vm2, %v2386_v9 }
 0x17d   :  { %2132 = vmatprep.mubr.msk.f32.mxu1 %vm2389_vm2, %v2386_v9  ;;  %2140 = vmatprep.subr.mxu1 %v2386_v9 }
 0x17e   :  { %v254_v34 = vpop.permute.xlu1 %253  ;;  %v239_v35 = vpop.permute.xlu0 %238  ;;  %v271_v36 = vld [vmem:[#allocation2 + $0x18] sm:$0xff]  ;;  %2145 = vmatprep.subr.mxu0 %v2386_v9  ;;  %v273_v39 = vld [vmem:[#allocation2 + $0x28] sm:$0xff] }
 0x17f   :  { %257 = vst.msk [vmem:[#allocation2 + $0x38] sm:$0xff] %vm154_vm1, %v254_v34  ;;  %242 = vst.msk [vmem:[#allocation2 + $0x30] sm:$0xff] %vm154_vm1, %v239_v35  ;;  %2133 = vmatmul.mubr.msk.f32.vlgmr.msra.gmra.mrb[6].mxu1 %vm154_vm1, %v271_v36  ;;  %2138 = vmatmul.mubr.msk.f32.vlgmr.msra.gmra.mrb[2].mxu0 %vm154_vm1, %v272_v37 }
 0x180   :  { %2141 = vmatpush3.xpose.msk.msra.mxu1 %vm154_vm1, %v281_v38  ;;  %2142 = vmatprep.mubr.msk.f32.mxu1 %vm2389_vm2, %v2386_v9 }
 0x181   :  { %2150 = vmatprep.subr.mxu1 %v2386_v9  ;;  %2147 = vmatprep.mubr.msk.f32.mxu0 %vm2389_vm2, %v2386_v9 }
 0x182   :  { %v282_v40 = vld [vmem:[#allocation3 + $0x30] sm:$0xff]  ;;  %v283_v41 = vld [vmem:[#allocation3 + $0x38] sm:$0xff] }
 0x183   :  { %2143 = vmatmul.mubr.msk.f32.vlgmr.msra.gmra.mrb[8].mxu1 %vm154_vm1, %v273_v39  ;;  %2146 = vmatpush3.xpose.msk.msra.mxu0 %vm154_vm1, %v282_v40 }
 0x184   :  { %2151 = vmatpush3.xpose.msk.msra.mxu1 %vm154_vm1, %v283_v41  ;;  %2152 = vmatprep.mubr.msk.f32.mxu1 %vm2389_vm2, %v2386_v9 }
 0x185   :  { %2155 = vmatprep.subr.mxu0 %v2386_v9  ;;  %2160 = vmatprep.subr.mxu1 %v2386_v9 }
 0x186   :  { %v274_v42 = vld [vmem:[#allocation2 + $0x30] sm:$0xff]  ;;  %v275_v43 = vld [vmem:[#allocation2 + $0x38] sm:$0xff] }
 0x187   :  { %2148 = vmatmul.mubr.msk.f32.vlgmr.msra.gmra.mrb[4].mxu0 %vm154_vm1, %v274_v42  ;;  %2153 = vmatmul.mubr.msk.f32.vlgmr.msra.gmra.mrb[10].mxu1 %vm154_vm1, %v275_v43 }
 0x188   :  { %2157 = vmatprep.mubr.msk.f32.mxu0 %vm2389_vm2, %v2386_v9  ;;  %2162 = vmatprep.mubr.msk.f32.mxu1 %vm2389_vm2, %v2386_v9 }
 0x249   :  { %v364_v44 = vpop.f32.mrb[2].mxu1 }
 0x24a   :  { %v2119_v45 = vpop.f32.mrb[3].mxu1  ;;  %v900_v46 = vsel %vm154_vm1, %v364_v44, -inf }
 0x24b   :  { %901 = vmax.xlane.f32.xlu0 %v900_v46 }
 0x24d   :  { %v440_v47 = vpop.f32.mrb[4].mxu1 }
 0x24e   :  { %v2124_v48 = vpop.f32.mrb[5].mxu1  ;;  %v516_v49 = vpop.f32.mrb[0].mxu0  ;;  %v903_v50 = vsel %vm154_vm1, %v440_v47, -inf }
 0x24f   :  { %v2129_v51 = vpop.f32.mrb[1].mxu0  ;;  %904 = vmax.xlane.f32.xlu1 %v903_v50  ;;  %v906_v52 = vsel %vm154_vm1, %v516_v49, -inf }
 0x250   :  { %907 = vmax.xlane.f32.xlu0 %v906_v52 }
 0x252   :  { %v592_v53 = vpop.f32.mrb[6].mxu1  ;;  %v668_v54 = vpop.f32.mrb[2].mxu0 }
 0x253   :  { %v2134_v55 = vpop.f32.mrb[7].mxu1  ;;  %v2139_v56 = vpop.f32.mrb[3].mxu0  ;;  %v912_v57 = vsel %vm154_vm1, %v668_v54, -inf  ;;  %v909_v58 = vsel %vm154_vm1, %v592_v53, -inf }
 0x254   :  { %913 = vmax.xlane.f32.xlu1 %v912_v57  ;;  %910 = vmax.xlane.f32.xlu0 %v909_v58 }
 0x256   :  { %v744_v59 = vpop.f32.mrb[8].mxu1 }
 0x257   :  { %v2144_v60 = vpop.f32.mrb[9].mxu1  ;;  %v915_v61 = vsel %vm154_vm1, %v744_v59, -inf }
 0x258   :  { %916 = vmax.xlane.f32.xlu0 %v915_v61 }
 0x25a   :  { %v820_v62 = vpop.f32.mrb[4].mxu0  ;;  %v896_v63 = vpop.f32.mrb[10].mxu1 }
 0x25b   :  { %v2149_v0 = vpop.f32.mrb[5].mxu0  ;;  %v2154_v1 = vpop.f32.mrb[11].mxu1  ;;  %v918_v2 = vsel %vm154_vm1, %v820_v62, -inf  ;;  %v921_v3 = vsel %vm154_vm1, %v896_v63, -inf }
 0x25c   :  { %919 = vmax.xlane.f32.xlu1 %v918_v2  ;;  %922 = vmax.xlane.f32.xlu0 %v921_v3 }
 0x26d   :  { %161 = vrot.lane.b32.xlu1 %v2514_v13, %s2395_s21 }
 0x271   :  { %190 = vrot.lane.b32.xlu1 %v2514_v13, %s2396_s22 }
 0x272   :  { %175 = vrot.lane.b32.xlu0 %v2514_v13, %s2397_s23 }
 0x275   :  { %205 = vrot.lane.b32.xlu1 %v2514_v13, %s2398_s24 }
 0x276   :  { %218 = vrot.lane.b32.xlu0 %v2512_v11, %s2395_s21 }
 0x279   :  { %233 = vrot.lane.b32.xlu1 %v2512_v11, %s2397_s23 }
 0x2d8   :  { %v902_v4 = vpop.xlane.xlu0 %901 }
 0x2d9   :  { %v924_v6 = vsub.f32 %v364_v44, %v902_v4 }
 0x2db   :  { %v932_v8 = vmul.f32 1.442695, %v924_v6 }
 0x2dc   :  { %v905_v10 = vpop.xlane.xlu1 %904 }
 0x2dd   :  { %2295 = vpow2.f32 %v932_v8  ;;  %v925_v12 = vsub.f32 %v440_v47, %v905_v10  ;;  %v908_v14 = vpop.xlane.xlu0 %907 }
 0x2de   :  { %v926_v15 = vsub.f32 %v516_v49, %v908_v14 }
 0x2df   :  { %v934_v16 = vmul.f32 1.442695, %v925_v12 }
 0x2e0   :  { %v936_v17 = vmul.f32 1.442695, %v926_v15 }
 0x2e1   :  { %2297 = vpow2.f32 %v934_v16  ;;  %v914_v18 = vpop.xlane.xlu1 %913  ;;  %v911_v19 = vpop.xlane.xlu0 %910 }
 0x2e2   :  { %2299 = vpow2.f32 %v936_v17  ;;  %v928_v20 = vsub.f32 %v668_v54, %v914_v18  ;;  %v927_v13 = vsub.f32 %v592_v53, %v911_v19 }
 0x2e4   :  { %v940_v21 = vmul.f32 1.442695, %v928_v20  ;;  %v938_v22 = vmul.f32 1.442695, %v927_v13 }
 0x2e5   :  { %v917_v23 = vpop.xlane.xlu0 %916 }
 0x2e6   :  { %2301 = vpow2.f32 %v940_v21  ;;  %v929_v24 = vsub.f32 %v744_v59, %v917_v23 }
 0x2e7   :  { %v2608_v25 = vpop.eup %2295  ;;  %2303 = vpow2.f32 %v938_v22 }
 0x2e8   :  { %v942_v26 = vmul.f32 1.442695, %v929_v24  ;;  %v948_v27 = vsel %vm154_vm1, %v2608_v25, 0.0 }
 0x2e9   :  { %949 = vadd.xlane.f32.xlu1 %v948_v27  ;;  %v920_v28 = vpop.xlane.xlu1 %919  ;;  %v923_v29 = vpop.xlane.xlu0 %922 }
 0x2ea   :  { %2305 = vpow2.f32 %v942_v26  ;;  %v930_v30 = vsub.f32 %v820_v62, %v920_v28  ;;  %v931_v31 = vsub.f32 %v896_v63, %v923_v29 }
 0x2eb   :  { %v2612_v32 = vpop.eup %2297 }
 0x2ec   :  { %v2614_v33 = vpop.eup %2299  ;;  %v944_v34 = vmul.f32 1.442695, %v930_v30  ;;  %v946_v35 = vmul.f32 1.442695, %v931_v31  ;;  %v951_v36 = vsel %vm154_vm1, %v2612_v32, 0.0 }
 0x2ed   :  { %v162_v37 = vpop.permute.xlu1 %161  ;;  %952 = vadd.xlane.f32.xlu0 %v951_v36  ;;  %v176_v38 = vpop.permute.xlu0 %175  ;;  %v954_v39 = vsel %vm154_vm1, %v2614_v33, 0.0  ;;  %v1612_v36 = vld [vmem:[%s2793_s3 + $0x18] sm:$0xff] }
 0x2ee   :  { %2307 = vpow2.f32 %v944_v34  ;;  %164 = vst.msk [vmem:[#allocation4] sm:$0xff] %vm154_vm1, %v162_v37  ;;  %179 = vst.msk [vmem:[#allocation4 + $0x8] sm:$0xff] %vm154_vm1, %v176_v38  ;;  %955 = vadd.xlane.f32.xlu1 %v954_v39 }
 0x2ef   :  { %2309 = vpow2.f32 %v946_v35  ;;  %v1611_v35 = vld [vmem:[%s2793_s3 + $0x10] sm:$0xff] }
 0x2f0   :  { %v2622_v40 = vpop.eup %2301  ;;  %v2248_v37 = vpack.c.bf16 %v1612_v36, %v1611_v35  ;;  %v2035_v35 = vld [vmem:[%s2800_s10] ss:$0 sm:$0xff] }
 0x2f1   :  { %v2624_v41 = vpop.eup %2303  ;;  %v191_v42 = vpop.permute.xlu1 %190  ;;  %v960_v44 = vsel %vm154_vm1, %v2622_v40, 0.0 }
 0x2f2   :  { %v219_v43 = vpop.permute.xlu0 %218  ;;  %194 = vst.msk [vmem:[#allocation4 + $0x10] sm:$0xff] %vm154_vm1, %v191_v42  ;;  %961 = vadd.xlane.f32.xlu1 %v960_v44  ;;  %v957_v45 = vsel %vm154_vm1, %v2624_v41, 0.0 }
 0x2f3   :  { %222 = vst.msk [vmem:[#allocation4 + $0x20] sm:$0xff] %vm154_vm1, %v219_v43  ;;  %958 = vadd.xlane.f32.xlu0 %v957_v45 }
 0x2f4   :  { %v2632_v46 = vpop.eup %2305 }
 0x2f5   :  { %v206_v47 = vpop.permute.xlu1 %205  ;;  %v284_v48 = vld [vmem:[#allocation4] sm:$0xff]  ;;  %v963_v49 = vsel %vm154_vm1, %v2632_v46, 0.0  ;;  %v285_v50 = vld [vmem:[#allocation4 + $0x8] sm:$0xff] }
 0x2f6   :  { %209 = vst.msk [vmem:[#allocation4 + $0x18] sm:$0xff] %vm154_vm1, %v206_v47  ;;  %2156 = vmatpush3.msra.mxu0 %v284_v48  ;;  %2161 = vmatpush3.msra.mxu1 %v285_v50 }
 0x2f7   :  { %964 = vadd.xlane.f32.xlu0 %v963_v49  ;;  %2165 = vmatprep.subr.mxu0 %v2386_v9 }
 0x2f8   :  { %v2638_v51 = vpop.eup %2307  ;;  %2170 = vmatprep.subr.mxu1 %v2386_v9 }
 0x2f9   :  { %v2641_v52 = vpop.eup %2309  ;;  %v234_v53 = vpop.permute.xlu1 %233  ;;  %v966_v54 = vsel %vm154_vm1, %v2638_v51, 0.0  ;;  %v286_v0 = vld [vmem:[#allocation4 + $0x10] sm:$0xff] }
 0x2fa   :  { %237 = vst.msk [vmem:[#allocation4 + $0x28] sm:$0xff] %vm154_vm1, %v234_v53  ;;  %967 = vadd.xlane.f32.xlu1 %v966_v54  ;;  %v969_v55 = vsel %vm154_vm1, %v2641_v52, 0.0  ;;  %v288_v10 = vld [vmem:[#allocation4 + $0x20] sm:$0xff] }
 0x2fb   :  { %970 = vadd.xlane.f32.xlu0 %v969_v55 }
 0x2fd   :  { %v287_v8 = vld [vmem:[#allocation4 + $0x18] sm:$0xff] }
 0x301   :  { %v289_v19 = vld [vmem:[#allocation4 + $0x28] sm:$0xff] }
 0x30b   :  { %263 = vrot.lane.b32.xlu1 %v2512_v11, %s2398_s24 }
 0x311   :  { %248 = vrot.lane.b32.xlu0 %v2512_v11, %s2396_s22 }
 0x376   :  { %v950_v56 = vpop.xlane.xlu1 %949 }
 0x377   :  { %2311 = vrcp.f32 %v950_v56  ;;  %v2031_v56 = vld [vmem:[%s2794_s4] ss:$0 sm:$0xff] }
 0x37a   :  { %v953_v57 = vpop.xlane.xlu0 %952 }
 0x37b   :  { %2313 = vrcp.f32 %v953_v57  ;;  %v956_v58 = vpop.xlane.xlu1 %955 }
 0x37c   :  { %2315 = vrcp.f32 %v956_v58 }
 0x37f   :  { %v962_v59 = vpop.xlane.xlu1 %961 }
 0x380   :  { %2317 = vrcp.f32 %v962_v59  ;;  %v959_v60 = vpop.xlane.xlu0 %958 }
 0x381   :  { %v2312_v61 = vpop.eup %2311  ;;  %2319 = vrcp.f32 %v959_v60 }
 0x382   :  { %v980_v62 = vmul.f32 %v2312_v61, %v2608_v25 }
 0x384   :  { %v965_v63 = vpop.xlane.xlu0 %964  ;;  %2158 = vmatmul.mubr.msk.f32.vlgmr.msra.gmra.mrb[6].mxu0 %vm154_vm1, %v980_v62 }
 0x385   :  { %v2314_v1 = vpop.eup %2313  ;;  %2321 = vrcp.f32 %v965_v63  ;;  %2166 = vmatpush3.msra.mxu0 %v286_v0  ;;  %2167 = vmatprep.mubr.msk.f32.mxu0 %vm2389_vm2, %v2386_v9 }
 0x386   :  { %v2316_v11 = vpop.eup %2315  ;;  %v981_v2 = vmul.f32 %v2314_v1, %v2612_v32  ;;  %2175 = vmatprep.subr.mxu0 %v2386_v9  ;;  %v1610_v32 = vld [vmem:[%s2793_s3 + $0x8] sm:$0xff] }
 0x387   :  { %v982_v3 = vmul.f32 %v2316_v11, %v2614_v33  ;;  %v968_v4 = vpop.xlane.xlu1 %967 }
 0x388   :  { %2323 = vrcp.f32 %v968_v4  ;;  %v971_v6 = vpop.xlane.xlu0 %970  ;;  %2163 = vmatmul.mubr.msk.f32.vlgmr.msra.gmra.mrb[12].mxu1 %vm154_vm1, %v981_v2 }
 0x389   :  { %2325 = vrcp.f32 %v971_v6  ;;  %2171 = vmatpush3.msra.mxu1 %v287_v8  ;;  %2168 = vmatmul.mubr.msk.f32.vlgmr.msra.gmra.mrb[8].mxu0 %vm154_vm1, %v982_v3 }
 0x38a   :  { %v2318_v12 = vpop.eup %2317  ;;  %2176 = vmatpush3.msra.mxu0 %v288_v10  ;;  %2172 = vmatprep.mubr.msk.f32.mxu1 %vm2389_vm2, %v2386_v9 }
 0x38b   :  { %v2320_v14 = vpop.eup %2319  ;;  %v984_v15 = vmul.f32 %v2318_v12, %v2622_v40  ;;  %v264_v16 = vpop.permute.xlu1 %263  ;;  %2177 = vmatprep.mubr.msk.f32.mxu0 %vm2389_vm2, %v2386_v9  ;;  %2180 = vmatprep.subr.mxu1 %v2386_v9 }
 0x38c   :  { %v983_v17 = vmul.f32 %v2320_v14, %v2624_v41  ;;  %267 = vst.msk [vmem:[#allocation4 + $0x38] sm:$0xff] %vm154_vm1, %v264_v16  ;;  %v249_v18 = vpop.permute.xlu0 %248  ;;  %2185 = vmatprep.subr.mxu0 %v2386_v9  ;;  %v1749_v14 = vld [vmem:[%s2795_s5 + $0x8] sm:$0xff]  ;;  %v1750_v16 = vld [vmem:[%s2795_s5 + $0x10] sm:$0xff] }
 0x38d   :  { %252 = vst.msk [vmem:[#allocation4 + $0x30] sm:$0xff] %vm154_vm1, %v249_v18  ;;  %2178 = vmatmul.mubr.msk.f32.vlgmr.msra.gmra.mrb[10].mxu0 %vm154_vm1, %v984_v15 }
 0x38e   :  { %2173 = vmatmul.mubr.msk.f32.vlgmr.msra.gmra.mrb[14].mxu1 %vm154_vm1, %v983_v17  ;;  %2187 = vmatprep.mubr.msk.f32.mxu0 %vm2389_vm2, %v2386_v9  ;;  %v1751_v17 = vld [vmem:[%s2795_s5 + $0x18] sm:$0xff] }
 0x38f   :  { %v2322_v20 = vpop.eup %2321  ;;  %2181 = vmatpush3.msra.mxu1 %v289_v19  ;;  %2182 = vmatprep.mubr.msk.f32.mxu1 %vm2389_vm2, %v2386_v9  ;;  %v2256_v18 = vpack.c.bf16 %v1751_v17, %v1750_v16  ;;  %v1842_v19 = vld [vmem:[%s2797_s7] sm:$0xff] }
 0x390   :  { %v985_v13 = vmul.f32 %v2322_v20, %v2632_v46  ;;  %2190 = vmatprep.subr.mxu1 %v2386_v9  ;;  %v1843_v20 = vld [vmem:[%s2797_s7 + $0x8] sm:$0xff]  ;;  %v2042_v16 = vld [vmem:[%s2801_s11] ss:$0 sm:$0xff] }
 0x392   :  { %v2324_v21 = vpop.eup %2323  ;;  %2183 = vmatmul.mubr.msk.f32.vlgmr.msra.gmra.mrb[16].mxu1 %vm154_vm1, %v985_v13  ;;  %v1844_v13 = vld [vmem:[%s2797_s7 + $0x10] sm:$0xff] }
 0x393   :  { %v2326_v22 = vpop.eup %2325  ;;  %v986_v23 = vmul.f32 %v2324_v21, %v2638_v51  ;;  %v291_v24 = vld [vmem:[#allocation4 + $0x38] sm:$0xff]  ;;  %2192 = vmatprep.mubr.msk.f32.mxu1 %vm2389_vm2, %v2386_v9  ;;  %v1609_v9 = vld [vmem:[%s2793_s3] sm:$0xff]  ;;  %v2260_v21 = vpack.c.bf16 %v1843_v20, %v1842_v19 }
 0x394   :  { %v987_v25 = vmul.f32 %v2326_v22, %v2641_v52  ;;  %v290_v26 = vld [vmem:[#allocation4 + $0x30] sm:$0xff]  ;;  %2191 = vmatpush3.msra.mxu1 %v291_v24  ;;  %v2244_v34 = vpack.c.bf16 %v1610_v32, %v1609_v9  ;;  %v1845_v22 = vld [vmem:[%s2797_s7 + $0x18] sm:$0xff]  ;;  %v1846_v24 = vld [vmem:[%s2797_s7 + $0x20] sm:$0xff] }
 0x395   :  { %2186 = vmatpush3.msra.mxu0 %v290_v26  ;;  %v2043_v20 = vld [vmem:[%s2802_s12] ss:$0 sm:$0xff] }
 0x396   :  { %2188 = vmatmul.mubr.msk.f32.vlgmr.msra.gmra.mrb[12].mxu0 %vm154_vm1, %v986_v23  ;;  %2193 = vmatmul.mubr.msk.f32.vlgmr.msra.gmra.mrb[18].mxu1 %vm154_vm1, %v987_v25  ;;  %v2264_v23 = vpack.c.bf16 %v1845_v22, %v1844_v13  ;;  %v1847_v25 = vld [vmem:[%s2797_s7 + $0x28] sm:$0xff] }
 0x397   :  { %2245 = vmatprep.subr.bf16.mxu0 %v2244_v34  ;;  %v2268_v26 = vpack.c.bf16 %v1847_v25, %v1846_v24 }
 0x398   :  { %2247 = vmatpush3.bf16.msra.mxu0 %v2244_v34 }
 0x399   :  { %2249 = vmatprep.subr.bf16.mxu0 %v2248_v37 }
 0x39c   :  { %2251 = vmatpush3.bf16.msra.mxu0 %v2248_v37 }
 0x39d   :  { %2261 = vmatprep.subr.bf16.mxu0 %v2260_v21 }
 0x457   :  { %v1057_v27 = vpop.f32.mrb[6].mxu0 }
 0x458   :  { %1572 = vst.msk [vmem:[#allocation5] sm:$0xff] %vm154_vm1, %v1057_v27  ;;  %v2159_v28 = vpop.f32.mrb[7].mxu0 }
 0x45b   :  { %v1130_v29 = vpop.f32.mrb[12].mxu1 }
 0x45c   :  { %v1203_v30 = vpop.f32.mrb[8].mxu0  ;;  %1574 = vrot.lane.b32.xlu0 %v1130_v29, %s2385_s19  ;;  %v2164_v31 = vpop.f32.mrb[13].mxu1 }
 0x45d   :  { %1580 = vrot.lane.b32.xlu1 %v1203_v30, %s2399_s30  ;;  %v2169_v33 = vpop.f32.mrb[9].mxu0 }
 0x45e   :  { %v2034_v33 = vld [vmem:[%s2799_s9] ss:$0 sm:$0xff] }
 0x460   :  { %v1349_v38 = vpop.f32.mrb[10].mxu0 }
 0x461   :  { %v1276_v39 = vpop.f32.mrb[14].mxu1  ;;  %1591 = vst.msk [vmem:[#allocation5 + $0x8] sm:$0xff] %vm154_vm1, %v1349_v38  ;;  %v2179_v40 = vpop.f32.mrb[11].mxu0 }
 0x462   :  { %1586 = vrot.lane.b32.xlu1 %v1276_v39, %s2400_s2  ;;  %v2174_v41 = vpop.f32.mrb[15].mxu1 }
 0x465   :  { %v1422_v42 = vpop.f32.mrb[16].mxu1 }
 0x466   :  { %1593 = vrot.lane.b32.xlu0 %v1422_v42, %s2385_s19  ;;  %v2184_v43 = vpop.f32.mrb[17].mxu1  ;;  %v1848_v42 = vld [vmem:[%s2797_s7 + $0x30] sm:$0xff] }
 0x467   :  { %v1849_v43 = vld [vmem:[%s2797_s7 + $0x38] sm:$0xff] }
 0x469   :  { %v1495_v44 = vpop.f32.mrb[12].mxu0  ;;  %v1568_v45 = vpop.f32.mrb[18].mxu1 }
 0x46a   :  { %v2189_v46 = vpop.f32.mrb[13].mxu0  ;;  %1598 = vrot.lane.b32.xlu0 %v1495_v44, %s2399_s30  ;;  %1603 = vrot.lane.b32.xlu1 %v1568_v45, %s2400_s2  ;;  %v2194_v47 = vpop.f32.mrb[19].mxu1  ;;  %v2272_v44 = vpack.c.bf16 %v1849_v43, %v1848_v42  ;;  %v2036_v45 = vld [vmem:[%s2796_s6] ss:$0 sm:$0xff]  ;;  %s2357_s30 = scalar_lea.vmem %s1993_s29, 256 }
 0x46b   :  { %p2358_p8 = scmp.ne.s32.totalorder %s1993_s29, %s2357_s30  ;;  %p2363_p10 = scmp.lt.s32.totalorder %s2357_s30, %s2357_s30 }
 0x46d   :  { %p2364_p11 = por %p2363_p10, %p2362_p9 }
 0x46f   :  { %p2365_p12 = pnand %p2364_p11, %p2358_p8 }
 0x4ce   :  { %v1575_v48 = vpop.permute.xlu0 %1574 }
 0x4cf   :  { %1578 = vst.msk [vmem:[#allocation5] sm:$0xff] %vm1577_vm3, %v1575_v48  ;;  %v1581_v49 = vpop.permute.xlu1 %1580 }
 0x4d0   :  { %1584 = vst.msk [vmem:[#allocation5] sm:$0xff] %vm1583_vm4, %v1581_v49 }
 0x4d4   :  { %v1587_v50 = vpop.permute.xlu1 %1586 }
 0x4d5   :  { %1590 = vst.msk [vmem:[#allocation5] sm:$0xff] %vm1589_vm5, %v1587_v50 }
 0x4d8   :  { %v1594_v51 = vpop.permute.xlu0 %1593 }
 0x4d9   :  { %1596 = vst.msk [vmem:[#allocation5 + $0x8] sm:$0xff] %vm1577_vm3, %v1594_v51 }
 0x4dc   :  { %v1599_v52 = vpop.permute.xlu0 %1598  ;;  %v1604_v53 = vpop.permute.xlu1 %1603  ;;  %v1607_v54 = vld [vmem:[#allocation5] sm:$0xff] }
 0x4dd   :  { %1601 = vst.msk [vmem:[#allocation5 + $0x8] sm:$0xff] %vm1583_vm4, %v1599_v52  ;;  %2203 = vmatprep.mubr.msk.f32.mxu0 %vm72_vm0, %v1607_v54  ;;  %v2039_v52 = vld [vmem:[%s2798_s8] ss:$0 sm:$0xff] }
 0x4de   :  { %1606 = vst.msk [vmem:[#allocation5 + $0x8] sm:$0xff] %vm1589_vm5, %v1604_v53 }
 0x4e5   :  { %v1608_v55 = vld [vmem:[#allocation5 + $0x8] sm:$0xff] }
 0x4e6   :  { %2204 = vmatmul.mubr.msk.f32.vlgmr.msra.gmra.mrb[14].mxu0 %vm72_vm0, %v1608_v55 }
 0x4e7   :  { %2263 = vmatpush3.bf16.msra.mxu0 %v2260_v21 }
 0x4e8   :  { %2265 = vmatprep.subr.bf16.mxu0 %v2264_v23 }
 0x4eb   :  { %2267 = vmatpush3.bf16.msra.mxu0 %v2264_v23 }
 0x4ec   :  { %2269 = vmatprep.subr.bf16.mxu0 %v2268_v26 }
 0x4ef   :  { %2271 = vmatpush3.bf16.msra.mxu0 %v2268_v26 }
 0x4f0   :  { %2273 = vmatprep.subr.bf16.mxu0 %v2272_v44 }
 0x4f3   :  { %2275 = vmatpush3.bf16.msra.mxu0 %v2272_v44 }
 0x5b9   :  { %v2205_v57 = vpop.f32.mrb[14].mxu0 }
 0x5ba   :  { %v1698_v58 = vadd.f32 %v2205_v57, %v2031_v56  ;;  %v1692_v59 = vpop.f32.mrb[15].mxu0 }
 0x5bb   :  { %v1693_v60 = vadd.f32 %v2031_v56, %v1692_v59 }
 0x5bc   :  { %v1702_v61 = vadd.f32 %v1698_v58, %v2503_v7 }
 0x5bd   :  { %v1701_v62 = vadd.f32 %v1693_v60, %v2499_v5  ;;  %v1748_v5 = vld [vmem:[%s2795_s5] sm:$0xff] }
 0x5be   :  { %v1708_v63 = vsel %vm72_vm0, %v1702_v61, 0.0  ;;  %v2252_v15 = vpack.c.bf16 %v1749_v14, %v1748_v5 }
 0x5bf   :  { %1709 = vadd.xlane.f32.xlu1 %v1708_v63  ;;  %v1705_v0 = vsel %vm72_vm0, %v1701_v62, 0.0 }
 0x5c0   :  { %1706 = vadd.xlane.f32.xlu0 %v1705_v0  ;;  %2253 = vmatprep.subr.bf16.mxu1 %v2252_v15 }
 0x5c1   :  { %2255 = vmatpush3.bf16.msra.mxu1 %v2252_v15 }
 0x5c2   :  { %2257 = vmatprep.subr.bf16.mxu1 %v2256_v18 }
 0x5c5   :  { %2259 = vmatpush3.bf16.msra.mxu1 %v2256_v18 }
 0x64c   :  { %v1710_v1 = vpop.xlane.xlu1 %1709 }
 0x64d   :  { %v1713_v11 = vmul.f32 0.03125, %v1710_v1  ;;  %v1707_v2 = vpop.xlane.xlu0 %1706 }
 0x64e   :  { %v1712_v3 = vmul.f32 0.03125, %v1707_v2 }
 0x64f   :  { %v1715_v4 = vsub.f32 %v1702_v61, %v1713_v11 }
 0x650   :  { %v1714_v6 = vsub.f32 %v1701_v62, %v1712_v3 }
 0x651   :  { %v1717_v12 = vmul.f32 %v1715_v4, %v1715_v4 }
 0x652   :  { %v1716_v8 = vmul.f32 %v1714_v6, %v1714_v6 }
 0x653   :  { %v1721_v7 = vsel %vm72_vm0, %v1717_v12, 0.0 }
 0x654   :  { %v1718_v10 = vsel %vm72_vm0, %v1716_v8, 0.0 }
 0x655   :  { %1719 = vadd.xlane.f32.xlu0 %v1718_v10 }
 0x659   :  { %1722 = vadd.xlane.f32.xlu0 %v1721_v7 }
 0x6e2   :  { %v1720_v27 = vpop.xlane.xlu0 %1719 }
 0x6e3   :  { %v1724_v28 = vmul.f32 0.03125, %v1720_v27 }
 0x6e5   :  { %v1726_v29 = vadd.f32 1e-05, %v1724_v28 }
 0x6e6   :  { %v1723_v30 = vpop.xlane.xlu0 %1722 }
 0x6e7   :  { %2327 = vrsqrt.f32 %v1726_v29  ;;  %v1725_v31 = vmul.f32 0.03125, %v1723_v30 }
 0x6e9   :  { %v1727_v9 = vadd.f32 1e-05, %v1725_v31 }
 0x6eb   :  { %2329 = vrsqrt.f32 %v1727_v9 }
 0x6f1   :  { %v2328_v32 = vpop.eup %2327 }
 0x6f2   :  { %v1730_v34 = vmul.f32 %v2328_v32, %v1714_v6 }
 0x6f4   :  { %v1738_v36 = vmul.f32 %v2034_v33, %v1730_v34 }
 0x6f5   :  { %v2330_v37 = vpop.eup %2329 }
 0x6f6   :  { %v1731_v38 = vmul.f32 %v2330_v37, %v1715_v4  ;;  %v1746_v39 = vadd.f32 %v2035_v35, %v1738_v36 }
 0x6f8   :  { %v1739_v40 = vmul.f32 %v2034_v33, %v1731_v38  ;;  %2214 = vmatprep.mubr.msk.f32.mxu1 %vm72_vm0, %v1746_v39 }
 0x6fa   :  { %v1747_v41 = vadd.f32 %v2035_v35, %v1739_v40 }
 0x6fc   :  { %2215 = vmatmul.mubr.msk.f32.vlgmr.msra.gmra.mrb[20].mxu1 %vm72_vm0, %v1747_v41 }
 0x7cf   :  { %v2216_v46 = vpop.f32.mrb[20].mxu1 }
 0x7d0   :  { %v1837_v47 = vadd.f32 %v2216_v46, %v2036_v45  ;;  %v1831_v48 = vpop.f32.mrb[21].mxu1 }
 0x7d1   :  { %v1832_v49 = vadd.f32 %v2036_v45, %v1831_v48 }
 0x7d2   :  { %v1841_v51 = vmax.f32 %v1837_v47, 0.0 }
 0x7d3   :  { %v1840_v50 = vmax.f32 %v1832_v49, 0.0 }
 0x7d5   :  { %2233 = vmatprep.mubr.msk.f32.mxu0 %vm1857_vm6, %v1840_v50 }
 0x7d6   :  { %2234 = vmatmul.mubr.msk.f32.vlgmr.msra.gmra.mrb[16].mxu0 %vm1857_vm6, %v1841_v51 }
 0x8a9   :  { %v2235_v53 = vpop.f32.mrb[16].mxu0 }
 0x8aa   :  { %v1936_v54 = vadd.f32 %v2235_v53, %v2039_v52  ;;  %v1930_v55 = vpop.f32.mrb[17].mxu0 }
 0x8ab   :  { %v1931_v56 = vadd.f32 %v2039_v52, %v1930_v55 }
 0x8ac   :  { %v1940_v57 = vadd.f32 %v1936_v54, %v1747_v41 }
 0x8ad   :  { %v1939_v58 = vadd.f32 %v1931_v56, %v1746_v39 }
 0x8ae   :  { %v1946_v59 = vsel %vm72_vm0, %v1940_v57, 0.0 }
 0x8af   :  { %1947 = vadd.xlane.f32.xlu0 %v1946_v59  ;;  %v1943_v60 = vsel %vm72_vm0, %v1939_v58, 0.0 }
 0x8b0   :  { %1944 = vadd.xlane.f32.xlu1 %v1943_v60 }
 0x93c   :  { %v1948_v61 = vpop.xlane.xlu0 %1947 }
 0x93d   :  { %v1950_v62 = vmul.f32 0.03125, %v1948_v61  ;;  %v1945_v63 = vpop.xlane.xlu1 %1944 }
 0x93e   :  { %v1949_v0 = vmul.f32 0.03125, %v1945_v63 }
 0x93f   :  { %v1952_v1 = vsub.f32 %v1940_v57, %v1950_v62 }
 0x940   :  { %v1951_v11 = vsub.f32 %v1939_v58, %v1949_v0 }
 0x941   :  { %v1954_v2 = vmul.f32 %v1952_v1, %v1952_v1 }
 0x942   :  { %v1953_v3 = vmul.f32 %v1951_v11, %v1951_v11 }
 0x943   :  { %v1958_v4 = vsel %vm72_vm0, %v1954_v2, 0.0 }
 0x944   :  { %1959 = vadd.xlane.f32.xlu0 %v1958_v4  ;;  %v1955_v6 = vsel %vm72_vm0, %v1953_v3, 0.0 }
 0x945   :  { %1956 = vadd.xlane.f32.xlu1 %v1955_v6 }
 0x9d1   :  { %v1960_v8 = vpop.xlane.xlu0 %1959 }
 0x9d2   :  { %v1962_v10 = vmul.f32 0.03125, %v1960_v8  ;;  %v1957_v12 = vpop.xlane.xlu1 %1956 }
 0x9d3   :  { %v1961_v7 = vmul.f32 0.03125, %v1957_v12 }
 0x9d4   :  { %v1964_v5 = vadd.f32 1e-05, %v1962_v10 }
 0x9d5   :  { %v1963_v14 = vadd.f32 1e-05, %v1961_v7 }
 0x9d6   :  { %2331 = vrsqrt.f32 %v1964_v5 }
 0x9d7   :  { %2333 = vrsqrt.f32 %v1963_v14 }
 0x9e0   :  { %v2332_v15 = vpop.eup %2331 }
 0x9e1   :  { %v2334_v17 = vpop.eup %2333  ;;  %v1968_v18 = vmul.f32 %v2332_v15, %v1952_v1 }
 0x9e2   :  { %v1967_v19 = vmul.f32 %v2334_v17, %v1951_v11 }
 0x9e3   :  { %v1976_v13 = vmul.f32 %v2042_v16, %v1968_v18 }
 0x9e4   :  { %v1975_v21 = vmul.f32 %v2042_v16, %v1967_v19 }
 0x9e5   :  { %v1984_v22 = vadd.f32 %v2043_v20, %v1976_v13 }
 0x9e6   :  { %v1983_v23 = vadd.f32 %v2043_v20, %v1975_v21 }
 0x9e7   :  { %1986 = vst.msk [vmem:[#allocation9 + $0x8] sm:$0xff] %vm72_vm0, %v1984_v22 }
 0x9e8   :  { %1985 = vst.msk [vmem:[#allocation9] sm:$0xff] %vm72_vm0, %v1983_v23 }
 0x9e9   :  { %2368 = shalt.err (!%p2365_p12)
}
 0x9ea   :  { %s2369_s0 = scalar_lea.hbm %s2803_s13, 256 }
 0x9eb   :  { %p2370_p13 = scmp.ne.s32.totalorder %s2803_s13, %s2369_s0  ;;  %p2373_p0 = scmp.lt.u32.totalorder %s2369_s0, %s2803_s13 }
 0x9ed   :  { %p2375_p1 = pnand %p2373_p0, %p2370_p13 }
 0x9ef   :  { %2378 = shalt.err (!%p2375_p1)
}
 0x9f0   :  { %1998 = dma.vmem_to_hbm [thread:$0]  %s1993_s29, 256, %s2803_s13, [#allocation8], %s2384_s18, %s2384_s18, %s2385_s19  }
 0x9f1   :  { %2381 = dma.done.wait [#allocation8], 256  }
 0x9f2   :  { %2382 = vsyncadd [#allocation8], 4294967040 }
 0x9f3   :  { %2002 = vsyncpa [#allocation7], 1 }
 0x9f4   :  { %2003 = vsyncpa [#allocation8], 1 }

</bundles_post_ra>
